<compile_context>
chip_gen: v7x
topology: tpu7x:2x2x1
jax: 0.10.0
libtpu: 0.0.40
codegen_flags: <defaults>
</compile_context>

<pallas_src>
import functools
import math

import jax
import jax.numpy as jnp
from jax.experimental import pallas as pl
from jax.experimental.pallas import tpu as pltpu

NEG_INF = -1e9


# ---------------------------------------------------------------------------
# Kernel: one decoder block for one (batch, query-block) grid cell
# ---------------------------------------------------------------------------
def decoder_block_kernel(
    x_ref,       # (1, T, D)  f32   full sequence (queries + K/V source)
    bias_ref,    # (TQ, T)    bf16  additive attention bias (0 keep / -1e9 masked)
    wq_ref,      # (H, D, hd) bf16  Q projection per head (1/sqrt(hd) pre-folded)
    wk_ref,      # (H, D, hd) bf16
    wv_ref,      # (H, D, hd) bf16
    wo_ref,      # (H, hd, D) bf16  output projection per head
    ln1g_ref,    # (1, D) f32
    ln1b_ref,    # (1, D) f32
    w1_ref,      # (D, F) bf16
    w2_ref,      # (F, D) bf16
    ln2g_ref,    # (1, D) f32
    ln2b_ref,    # (1, D) f32
    o_ref,       # (1, TQ, D) f32
    k_sc,        # scratch (H, T, hd) bf16  (persists across the qi grid axis)
    v_sc,        # scratch (H, T, hd) bf16
):
    qi = pl.program_id(1)
    T, D = x_ref.shape[1], x_ref.shape[2]
    TQ = bias_ref.shape[0]
    H, hd = wq_ref.shape[0], wq_ref.shape[2]

    # ---- K/V projection: computed ONCE per (layer, batch element) -----------
    @pl.when(qi == 0)
    def _():
        xb = x_ref[0].astype(jnp.bfloat16)                           # (T, D)
        for h in range(H):   # static unroll; slicing the weight along the major axis is free
            k_sc[h] = jnp.dot(xb, wk_ref[h],
                              preferred_element_type=jnp.float32).astype(jnp.bfloat16)
            v_sc[h] = jnp.dot(xb, wv_ref[h],
                              preferred_element_type=jnp.float32).astype(jnp.bfloat16)

    # ---- query rows for this block (sliced from the resident full-seq tile) -
    start = pl.multiple_of(qi * TQ, TQ)
    xq = x_ref[0, pl.ds(start, TQ), :]                               # (TQ, D) f32 (residual path)
    xq_b = xq.astype(jnp.bfloat16)
    bias = bias_ref[...].astype(jnp.float32)                         # (TQ, T)

    # ---- attention: per-head, output projection accumulated -----------------
    # No (H, TQ, T) / (H, TQ, D) f32 intermediates; peak transient is one
    # (TQ, T) score tile regardless of H.
    attn = jnp.zeros((TQ, D), jnp.float32)
    for h in range(H):
        q_h = jnp.dot(xq_b, wq_ref[h],
                      preferred_element_type=jnp.float32).astype(jnp.bfloat16)   # (TQ, hd)
        s = jnp.einsum("qd,kd->qk", q_h, k_sc[h],
                       preferred_element_type=jnp.float32)                       # (TQ, T)
        s = s + bias
        m = jnp.max(s, axis=-1, keepdims=True)
        p = jnp.exp(s - m)
        p = p * pl.reciprocal(jnp.sum(p, axis=-1, keepdims=True), approx=True)   # EUP, not VPU divide
        ctx = jnp.dot(p.astype(jnp.bfloat16), v_sc[h],
                      preferred_element_type=jnp.float32)                        # (TQ, hd)
        attn = attn + jnp.dot(ctx.astype(jnp.bfloat16), wo_ref[h],
                              preferred_element_type=jnp.float32)                # (TQ, D)

    # ---- residual + LayerNorm 1 (f32) ----------------------------------------
    h1 = xq + attn
    mu1 = jnp.mean(h1, axis=-1, keepdims=True)
    var1 = jnp.mean((h1 - mu1) ** 2, axis=-1, keepdims=True)
    h1n = (h1 - mu1) * jax.lax.rsqrt(var1 + 1e-5)
    h1n = h1n * ln1g_ref[...] + ln1b_ref[...]

    # ---- feed-forward (bf16 MXU matmuls, f32 accumulation) -------------------
    f = jnp.dot(h1n.astype(jnp.bfloat16), w1_ref[...],
                preferred_element_type=jnp.float32)
    f = jnp.maximum(f, 0.0)
    f = jnp.dot(f.astype(jnp.bfloat16), w2_ref[...],
                preferred_element_type=jnp.float32)

    # ---- residual + LayerNorm 2 ----------------------------------------------
    h2 = h1n + f
    mu2 = jnp.mean(h2, axis=-1, keepdims=True)
    var2 = jnp.mean((h2 - mu2) ** 2, axis=-1, keepdims=True)
    h2n = (h2 - mu2) * jax.lax.rsqrt(var2 + 1e-5)
    o_ref[0] = h2n * ln2g_ref[...] + ln2b_ref[...]


# ---------------------------------------------------------------------------
# Wrapper helpers
# ---------------------------------------------------------------------------
def _const_spec(shape):
    """BlockSpec for a grid-invariant operand: full block, single-buffered."""
    ndim = len(shape)

    def idx(*_):
        return (0,) * ndim

    return pl.BlockSpec(shape, idx, pipeline_mode=pl.Buffered(1))


def _tpu_vmem_capacity_bytes(default=128 * 1024 * 1024):
    try:
        return int(pltpu.get_tpu_info().vmem_capacity_bytes)
    except Exception:
        return default


def _pick_query_block(T, q_block_rows):
    if T <= q_block_rows:
        return T
    tq = (q_block_rows // 8) * 8
    while tq >= 8 and T % tq != 0:
        tq -= 8
    return tq if tq >= 8 else T


# ---------------------------------------------------------------------------
# Wrapper: one decoder block over the full batch
# ---------------------------------------------------------------------------
def decoder_block(x, mask_bias, prep, *, q_block_rows=None, vmem_limit_bytes=None):
    N, T, D = x.shape
    H, _, hd = prep["wq_h"].shape
    F = prep["w1"].shape[1]

    vmem_cap = _tpu_vmem_capacity_bytes()
    if q_block_rows is None:
        # Smaller query tile on 64 MiB-VMEM parts (v7x), larger on 128 MiB parts.
        q_block_rows = 256 if vmem_cap >= 100 * 1024 * 1024 else 128

    TQ = _pick_query_block(T, q_block_rows)
    n_q = T // TQ

    if vmem_limit_bytes is None:
        lane = 128
        hd_pad = ((hd + lane - 1) // lane) * lane          # lane padding of (., hd) tiles
        est = (
            2 * T * D * 4                 # full-seq x block (double-buffered, f32)
            + 2 * TQ * T * 2              # bias block (double-buffered, bf16)
            + 2 * TQ * D * 4              # output block (double-buffered, f32)
            + 3 * H * D * hd_pad * 2      # wq / wk / wv (single-buffered, bf16)
            + H * hd * D * 2              # wo
            + 2 * D * F * 2               # FFN weights
            + 2 * H * T * hd_pad * 2      # K/V scratch
            + TQ * T * 4                  # score transient
            + TQ * F * 4                  # FFN activation transient
            + 6 * TQ * D * 4              # misc f32 transients / residuals
            + 4 * D * 4                   # LayerNorm params
        )
        vmem_limit_bytes = int(min(max(2 * est, 32 * 1024 * 1024), vmem_cap * 3 // 4))

    return pl.pallas_call(
        decoder_block_kernel,
        out_shape=jax.ShapeDtypeStruct((N, T, D), jnp.float32),
        grid=(N, n_q),
        in_specs=[
            pl.BlockSpec((1, T, D), lambda n, qi: (n, 0, 0)),   # x (full sequence)
            pl.BlockSpec((TQ, T), lambda n, qi: (qi, 0)),       # additive mask bias
            _const_spec((H, D, hd)),      # wq (per head, scale folded)
            _const_spec((H, D, hd)),      # wk
            _const_spec((H, D, hd)),      # wv
            _const_spec((H, hd, D)),      # wo
            _const_spec((1, D)),          # ln1 gamma
            _const_spec((1, D)),          # ln1 beta
            _const_spec((D, F)),          # w1
            _const_spec((F, D)),          # w2
            _const_spec((1, D)),          # ln2 gamma
            _const_spec((1, D)),          # ln2 beta
        ],
        out_specs=pl.BlockSpec((1, TQ, D), lambda n, qi: (n, qi, 0)),
        scratch_shapes=[
            pltpu.VMEM((H, T, hd), jnp.bfloat16),   # K cache (per batch element)
            pltpu.VMEM((H, T, hd), jnp.bfloat16),   # V cache
        ],
        compiler_params=pltpu.CompilerParams(
            # qi must be "arbitrary": the K/V scratch written at qi == 0 is
            # reused by all later qi steps of the same batch element.
            dimension_semantics=("parallel", "arbitrary"),
            vmem_limit_bytes=vmem_limit_bytes,
        ),
    )(
        x, mask_bias,
        prep["wq_h"], prep["wk_h"], prep["wv_h"], prep["wo_h"],
        prep["ln1_g"], prep["ln1_b"],
        prep["w1"], prep["w2"],
        prep["ln2_g"], prep["ln2_b"],
    )


def prepare_decoder_params(layer_params, num_heads):
    """One-time weight preparation: bf16 cast, head reshape, scale folding.

    Doing this once (instead of per forward call) removes recurring HBM
    read/write traffic and the extra XLA cast kernels before every layer.
    """
    prepared = []
    for p in layer_params:
        D = p["wqkv"].shape[0]
        H = num_heads
        assert D % H == 0
        hd = D // H
        scale = 1.0 / math.sqrt(hd)
        wq = (p["wqkv"][:, :D] * scale).astype(jnp.bfloat16)       # fold 1/sqrt(hd) into Wq
        wk = p["wqkv"][:, D:2 * D].astype(jnp.bfloat16)
        wv = p["wqkv"][:, 2 * D:].astype(jnp.bfloat16)
        prepared.append({
            "wq_h": wq.reshape(D, H, hd).transpose(1, 0, 2),       # (H, D, hd)
            "wk_h": wk.reshape(D, H, hd).transpose(1, 0, 2),
            "wv_h": wv.reshape(D, H, hd).transpose(1, 0, 2),
            "wo_h": p["wo"].astype(jnp.bfloat16).reshape(H, hd, D),
            "ln1_g": p["ln1_g"], "ln1_b": p["ln1_b"],
            "w1": p["w1"].astype(jnp.bfloat16),
            "w2": p["w2"].astype(jnp.bfloat16),
            "ln2_g": p["ln2_g"], "ln2_b": p["ln2_b"],
        })
    return prepared


def decoder(x, mask, prepared_layer_params):
    """Full Decoder: stack of num_layers decoder blocks (applied sequentially)."""
    # Precompute the additive attention bias ONCE (0 keep / -1e9 masked), bf16
    # to halve the recurring per-layer mask DMA; no compare/select in-kernel.
    # TODO(synk): 3D/4D mask variants only change this broadcast + the bias BlockSpec.
    mask_bias = jnp.where(mask == 0, NEG_INF, 0.0).astype(jnp.bfloat16)
    for prep in prepared_layer_params:
        x = decoder_block(x, mask_bias, prep)
    return x


# ---------------------------------------------------------------------------
# Pure-JAX reference (f32, same math) for correctness check
# ---------------------------------------------------------------------------
def decoder_block_ref(x, mask, p, num_heads):
    N, T, D = x.shape
    hd = D // num_heads
    qkv = x @ p["wqkv"]
    q, k, v = qkv[..., :D], qkv[..., D:2 * D], qkv[..., 2 * D:]
    q = q.reshape(N, T, num_heads, hd).transpose(0, 2, 1, 3)
    k = k.reshape(N, T, num_heads, hd).transpose(0, 2, 1, 3)
    v = v.reshape(N, T, num_heads, hd).transpose(0, 2, 1, 3)
    s = jnp.einsum("nhqd,nhkd->nhqk", q, k) / math.sqrt(hd)
    s = jnp.where(mask[None, None] == 0, NEG_INF, s)
    p_attn = jax.nn.softmax(s, axis=-1)
    attn = jnp.einsum("nhqk,nhkd->nhqd", p_attn, v)
    attn = attn.transpose(0, 2, 1, 3).reshape(N, T, D) @ p["wo"]

    def ln(h, g, b):
        mu = jnp.mean(h, axis=-1, keepdims=True)
        var = jnp.mean((h - mu) ** 2, axis=-1, keepdims=True)
        return (h - mu) * jax.lax.rsqrt(var + 1e-5) * g + b

    h1 = ln(x + attn, p["ln1_g"], p["ln1_b"])
    f = jnp.maximum(h1 @ p["w1"], 0.0) @ p["w2"]
    return ln(h1 + f, p["ln2_g"], p["ln2_b"])


def decoder_ref(x, mask, layer_params, num_heads):
    for p in layer_params:
        x = decoder_block_ref(x, mask, p, num_heads)
    return x


# ---------------------------------------------------------------------------
# Parameter init
# ---------------------------------------------------------------------------
def init_layer_params(key, embed_dim, dim_feedfwd):
    ks = jax.random.split(key, 4)
    s = 0.02
    return {
        "wqkv": s * jax.random.normal(ks[0], (embed_dim, 3 * embed_dim), jnp.float32),
        "wo":   s * jax.random.normal(ks[1], (embed_dim, embed_dim), jnp.float32),
        "ln1_g": jnp.ones((1, embed_dim), jnp.float32),
        "ln1_b": jnp.zeros((1, embed_dim), jnp.float32),
        "w1":   s * jax.random.normal(ks[2], (embed_dim, dim_feedfwd), jnp.float32),
        "w2":   s * jax.random.normal(ks[3], (dim_feedfwd, embed_dim), jnp.float32),
        "ln2_g": jnp.ones((1, embed_dim), jnp.float32),
        "ln2_b": jnp.zeros((1, embed_dim), jnp.float32),
    }


if __name__ == "__main__":
    # Small shapes consistent with the module's forward: x is (N, T, embed_dim).
    # embed_dim=128 so the lane dimension is non-degenerate (full 128 lanes).
    N, T = 2, 16
    num_layers, embed_dim, num_heads, dim_feedfwd = 2, 128, 4, 256

    key = jax.random.PRNGKey(0)
    kx, *kl = jax.random.split(key, 1 + num_layers)
    x = jax.random.normal(kx, (N, T, embed_dim), jnp.float32)
    # Causal mask (2D case of the reference's 2D/3D/4D mask argument).
    mask = jnp.tril(jnp.ones((T, T), jnp.float32))

    layer_params = [init_layer_params(k, embed_dim, dim_feedfwd) for k in kl]
    # One-time weight preparation (bf16 cast, head reshape, scale folding).
    prepared = prepare_decoder_params(layer_params, num_heads)

    out = decoder(x, mask, prepared)
    out = jax.block_until_ready(out)

    ref = decoder_ref(x, mask, layer_params, num_heads)
    assert out.shape == (N, T, embed_dim)
    # bf16 MXU matmuls + approx reciprocal vs. an f32 reference -> loose-ish tol.
    assert jnp.allclose(out, ref, atol=3e-2, rtol=3e-2), "mismatch vs JAX reference"

    print("KERNEL_OK")
</pallas_src>

<mosaic_0001>
module attributes {stable_mosaic.version = 11 : i64} {
  func.func @decoder_block_kernel(%arg0: i32, %arg1: i32, %arg2: memref<1x16x128xf32, #tpu.memory_space<vmem>>, %arg3: memref<16x16xbf16, #tpu.memory_space<vmem>>, %arg4: memref<4x128x32xbf16, #tpu.memory_space<vmem>>, %arg5: memref<4x128x32xbf16, #tpu.memory_space<vmem>>, %arg6: memref<4x128x32xbf16, #tpu.memory_space<vmem>>, %arg7: memref<4x32x128xbf16, #tpu.memory_space<vmem>>, %arg8: memref<1x128xf32, #tpu.memory_space<vmem>>, %arg9: memref<1x128xf32, #tpu.memory_space<vmem>>, %arg10: memref<128x256xbf16, #tpu.memory_space<vmem>>, %arg11: memref<256x128xbf16, #tpu.memory_space<vmem>>, %arg12: memref<1x128xf32, #tpu.memory_space<vmem>>, %arg13: memref<1x128xf32, #tpu.memory_space<vmem>>, %arg14: memref<1x16x128xf32, #tpu.memory_space<vmem>>, %arg15: memref<4x16x32xbf16, #tpu.memory_space<vmem>>, %arg16: memref<4x16x32xbf16, #tpu.memory_space<vmem>>) attributes {dimension_semantics = [#tpu.dimension_semantics<parallel>, #tpu.dimension_semantics<arbitrary>], iteration_bounds = array<i64: 2, 1>, scalar_prefetch = 0 : i64, scratch_operands = 2 : i64, tpu.core_type = #tpu.core_type<tc>, window_params = [{transform_indices = @transform_0, window_bounds = array<i64: 1, 16, 128>}, {transform_indices = @transform_1, window_bounds = array<i64: 16, 16>}, {pipeline_mode = #tpu.pipeline_mode<synchronous>, transform_indices = @transform_2, window_bounds = array<i64: 4, 128, 32>}, {pipeline_mode = #tpu.pipeline_mode<synchronous>, transform_indices = @transform_3, window_bounds = array<i64: 4, 128, 32>}, {pipeline_mode = #tpu.pipeline_mode<synchronous>, transform_indices = @transform_4, window_bounds = array<i64: 4, 128, 32>}, {pipeline_mode = #tpu.pipeline_mode<synchronous>, transform_indices = @transform_5, window_bounds = array<i64: 4, 32, 128>}, {pipeline_mode = #tpu.pipeline_mode<synchronous>, transform_indices = @transform_6, window_bounds = array<i64: 1, 128>}, {pipeline_mode = #tpu.pipeline_mode<synchronous>, transform_indices = @transform_7, window_bounds = array<i64: 1, 128>}, {pipeline_mode = #tpu.pipeline_mode<synchronous>, transform_indices = @transform_8, window_bounds = array<i64: 128, 256>}, {pipeline_mode = #tpu.pipeline_mode<synchronous>, transform_indices = @transform_9, window_bounds = array<i64: 256, 128>}, {pipeline_mode = #tpu.pipeline_mode<synchronous>, transform_indices = @transform_10, window_bounds = array<i64: 1, 128>}, {pipeline_mode = #tpu.pipeline_mode<synchronous>, transform_indices = @transform_11, window_bounds = array<i64: 1, 128>}, {transform_indices = @transform_12, window_bounds = array<i64: 1, 16, 128>}]} {
    %c0_i32 = arith.constant 0 : i32
    %0 = arith.cmpi eq, %arg1, %c0_i32 : i32
    %1 = arith.extui %0 : i1 to i32
    %c0_i32_0 = arith.constant 0 : i32
    %2 = arith.cmpi ne, %1, %c0_i32_0 : i32
    scf.if %2 {
      %c0_101 = arith.constant 0 : index
      %c0_102 = arith.constant 0 : index
      %c0_103 = arith.constant 0 : index
      %181 = vector.load %arg2[%c0_101, %c0_102, %c0_103] : memref<1x16x128xf32, #tpu.memory_space<vmem>>, vector<1x16x128xf32>
      %182 = vector.shape_cast %181 : vector<1x16x128xf32> to vector<16x128xf32>
      %183 = arith.truncf %182 : vector<16x128xf32> to vector<16x128xbf16>
      %c0_104 = arith.constant 0 : index
      %c0_105 = arith.constant 0 : index
      %c0_106 = arith.constant 0 : index
      %184 = vector.load %arg5[%c0_104, %c0_105, %c0_106] : memref<4x128x32xbf16, #tpu.memory_space<vmem>>, vector<1x128x32xbf16>
      %185 = vector.shape_cast %184 : vector<1x128x32xbf16> to vector<128x32xbf16>
      %cst_107 = arith.constant dense<0.000000e+00> : vector<16x32xf32>
      %186 = tpu.matmul %183, %185, %cst_107 {dimension_numbers = #tpu.dot_dimension_numbers<[1], [0], [0], [1], [0, 0, 1, 1], [], []>} : vector<16x128xbf16>, vector<128x32xbf16>, vector<16x32xf32> -> vector<16x32xf32>
      %187 = arith.truncf %186 : vector<16x32xf32> to vector<16x32xbf16>
      %c0_108 = arith.constant 0 : index
      %c0_109 = arith.constant 0 : index
      %c0_110 = arith.constant 0 : index
      %188 = vector.load %arg15[%c0_108, %c0_109, %c0_110] : memref<4x16x32xbf16, #tpu.memory_space<vmem>>, vector<1x16x32xbf16>
      %189 = vector.shape_cast %188 : vector<1x16x32xbf16> to vector<16x32xbf16>
      %190 = vector.shape_cast %187 : vector<16x32xbf16> to vector<1x16x32xbf16>
      tpu.vector_store %arg15[%c0_108, %c0_109, %c0_110], %190 {strides = array<i32>} : memref<4x16x32xbf16, #tpu.memory_space<vmem>>, vector<1x16x32xbf16>,
      %c0_111 = arith.constant 0 : index
      %c0_112 = arith.constant 0 : index
      %c0_113 = arith.constant 0 : index
      %191 = vector.load %arg6[%c0_111, %c0_112, %c0_113] : memref<4x128x32xbf16, #tpu.memory_space<vmem>>, vector<1x128x32xbf16>
      %192 = vector.shape_cast %191 : vector<1x128x32xbf16> to vector<128x32xbf16>
      %cst_114 = arith.constant dense<0.000000e+00> : vector<16x32xf32>
      %193 = tpu.matmul %183, %192, %cst_114 {dimension_numbers = #tpu.dot_dimension_numbers<[1], [0], [0], [1], [0, 0, 1, 1], [], []>} : vector<16x128xbf16>, vector<128x32xbf16>, vector<16x32xf32> -> vector<16x32xf32>
      %194 = arith.truncf %193 : vector<16x32xf32> to vector<16x32xbf16>
      %c0_115 = arith.constant 0 : index
      %c0_116 = arith.constant 0 : index
      %c0_117 = arith.constant 0 : index
      %195 = vector.load %arg16[%c0_115, %c0_116, %c0_117] : memref<4x16x32xbf16, #tpu.memory_space<vmem>>, vector<1x16x32xbf16>
      %196 = vector.shape_cast %195 : vector<1x16x32xbf16> to vector<16x32xbf16>
      %197 = vector.shape_cast %194 : vector<16x32xbf16> to vector<1x16x32xbf16>
      tpu.vector_store %arg16[%c0_115, %c0_116, %c0_117], %197 {strides = array<i32>} : memref<4x16x32xbf16, #tpu.memory_space<vmem>>, vector<1x16x32xbf16>,
      %c1_118 = arith.constant 1 : index
      %c0_119 = arith.constant 0 : index
      %c0_120 = arith.constant 0 : index
      %198 = vector.load %arg5[%c1_118, %c0_119, %c0_120] : memref<4x128x32xbf16, #tpu.memory_space<vmem>>, vector<1x128x32xbf16>
      %199 = vector.shape_cast %198 : vector<1x128x32xbf16> to vector<128x32xbf16>
      %cst_121 = arith.constant dense<0.000000e+00> : vector<16x32xf32>
      %200 = tpu.matmul %183, %199, %cst_121 {dimension_numbers = #tpu.dot_dimension_numbers<[1], [0], [0], [1], [0, 0, 1, 1], [], []>} : vector<16x128xbf16>, vector<128x32xbf16>, vector<16x32xf32> -> vector<16x32xf32>
      %201 = arith.truncf %200 : vector<16x32xf32> to vector<16x32xbf16>
      %c1_122 = arith.constant 1 : index
      %c0_123 = arith.constant 0 : index
      %c0_124 = arith.constant 0 : index
      %202 = vector.load %arg15[%c1_122, %c0_123, %c0_124] : memref<4x16x32xbf16, #tpu.memory_space<vmem>>, vector<1x16x32xbf16>
      %203 = vector.shape_cast %202 : vector<1x16x32xbf16> to vector<16x32xbf16>
      %204 = vector.shape_cast %201 : vector<16x32xbf16> to vector<1x16x32xbf16>
      tpu.vector_store %arg15[%c1_122, %c0_123, %c0_124], %204 {strides = array<i32>} : memref<4x16x32xbf16, #tpu.memory_space<vmem>>, vector<1x16x32xbf16>,
      %c1_125 = arith.constant 1 : index
      %c0_126 = arith.constant 0 : index
      %c0_127 = arith.constant 0 : index
      %205 = vector.load %arg6[%c1_125, %c0_126, %c0_127] : memref<4x128x32xbf16, #tpu.memory_space<vmem>>, vector<1x128x32xbf16>
      %206 = vector.shape_cast %205 : vector<1x128x32xbf16> to vector<128x32xbf16>
      %cst_128 = arith.constant dense<0.000000e+00> : vector<16x32xf32>
      %207 = tpu.matmul %183, %206, %cst_128 {dimension_numbers = #tpu.dot_dimension_numbers<[1], [0], [0], [1], [0, 0, 1, 1], [], []>} : vector<16x128xbf16>, vector<128x32xbf16>, vector<16x32xf32> -> vector<16x32xf32>
      %208 = arith.truncf %207 : vector<16x32xf32> to vector<16x32xbf16>
      %c1_129 = arith.constant 1 : index
      %c0_130 = arith.constant 0 : index
      %c0_131 = arith.constant 0 : index
      %209 = vector.load %arg16[%c1_129, %c0_130, %c0_131] : memref<4x16x32xbf16, #tpu.memory_space<vmem>>, vector<1x16x32xbf16>
      %210 = vector.shape_cast %209 : vector<1x16x32xbf16> to vector<16x32xbf16>
      %211 = vector.shape_cast %208 : vector<16x32xbf16> to vector<1x16x32xbf16>
      tpu.vector_store %arg16[%c1_129, %c0_130, %c0_131], %211 {strides = array<i32>} : memref<4x16x32xbf16, #tpu.memory_space<vmem>>, vector<1x16x32xbf16>,
      %c2_132 = arith.constant 2 : index
      %c0_133 = arith.constant 0 : index
      %c0_134 = arith.constant 0 : index
      %212 = vector.load %arg5[%c2_132, %c0_133, %c0_134] : memref<4x128x32xbf16, #tpu.memory_space<vmem>>, vector<1x128x32xbf16>
      %213 = vector.shape_cast %212 : vector<1x128x32xbf16> to vector<128x32xbf16>
      %cst_135 = arith.constant dense<0.000000e+00> : vector<16x32xf32>
      %214 = tpu.matmul %183, %213, %cst_135 {dimension_numbers = #tpu.dot_dimension_numbers<[1], [0], [0], [1], [0, 0, 1, 1], [], []>} : vector<16x128xbf16>, vector<128x32xbf16>, vector<16x32xf32> -> vector<16x32xf32>
      %215 = arith.truncf %214 : vector<16x32xf32> to vector<16x32xbf16>
      %c2_136 = arith.constant 2 : index
      %c0_137 = arith.constant 0 : index
      %c0_138 = arith.constant 0 : index
      %216 = vector.load %arg15[%c2_136, %c0_137, %c0_138] : memref<4x16x32xbf16, #tpu.memory_space<vmem>>, vector<1x16x32xbf16>
      %217 = vector.shape_cast %216 : vector<1x16x32xbf16> to vector<16x32xbf16>
      %218 = vector.shape_cast %215 : vector<16x32xbf16> to vector<1x16x32xbf16>
      tpu.vector_store %arg15[%c2_136, %c0_137, %c0_138], %218 {strides = array<i32>} : memref<4x16x32xbf16, #tpu.memory_space<vmem>>, vector<1x16x32xbf16>,
      %c2_139 = arith.constant 2 : index
      %c0_140 = arith.constant 0 : index
      %c0_141 = arith.constant 0 : index
      %219 = vector.load %arg6[%c2_139, %c0_140, %c0_141] : memref<4x128x32xbf16, #tpu.memory_space<vmem>>, vector<1x128x32xbf16>
      %220 = vector.shape_cast %219 : vector<1x128x32xbf16> to vector<128x32xbf16>
      %cst_142 = arith.constant dense<0.000000e+00> : vector<16x32xf32>
      %221 = tpu.matmul %183, %220, %cst_142 {dimension_numbers = #tpu.dot_dimension_numbers<[1], [0], [0], [1], [0, 0, 1, 1], [], []>} : vector<16x128xbf16>, vector<128x32xbf16>, vector<16x32xf32> -> vector<16x32xf32>
      %222 = arith.truncf %221 : vector<16x32xf32> to vector<16x32xbf16>
      %c2_143 = arith.constant 2 : index
      %c0_144 = arith.constant 0 : index
      %c0_145 = arith.constant 0 : index
      %223 = vector.load %arg16[%c2_143, %c0_144, %c0_145] : memref<4x16x32xbf16, #tpu.memory_space<vmem>>, vector<1x16x32xbf16>
      %224 = vector.shape_cast %223 : vector<1x16x32xbf16> to vector<16x32xbf16>
      %225 = vector.shape_cast %222 : vector<16x32xbf16> to vector<1x16x32xbf16>
      tpu.vector_store %arg16[%c2_143, %c0_144, %c0_145], %225 {strides = array<i32>} : memref<4x16x32xbf16, #tpu.memory_space<vmem>>, vector<1x16x32xbf16>,
      %c3_146 = arith.constant 3 : index
      %c0_147 = arith.constant 0 : index
      %c0_148 = arith.constant 0 : index
      %226 = vector.load %arg5[%c3_146, %c0_147, %c0_148] : memref<4x128x32xbf16, #tpu.memory_space<vmem>>, vector<1x128x32xbf16>
      %227 = vector.shape_cast %226 : vector<1x128x32xbf16> to vector<128x32xbf16>
      %cst_149 = arith.constant dense<0.000000e+00> : vector<16x32xf32>
      %228 = tpu.matmul %183, %227, %cst_149 {dimension_numbers = #tpu.dot_dimension_numbers<[1], [0], [0], [1], [0, 0, 1, 1], [], []>} : vector<16x128xbf16>, vector<128x32xbf16>, vector<16x32xf32> -> vector<16x32xf32>
      %229 = arith.truncf %228 : vector<16x32xf32> to vector<16x32xbf16>
      %c3_150 = arith.constant 3 : index
      %c0_151 = arith.constant 0 : index
      %c0_152 = arith.constant 0 : index
      %230 = vector.load %arg15[%c3_150, %c0_151, %c0_152] : memref<4x16x32xbf16, #tpu.memory_space<vmem>>, vector<1x16x32xbf16>
      %231 = vector.shape_cast %230 : vector<1x16x32xbf16> to vector<16x32xbf16>
      %232 = vector.shape_cast %229 : vector<16x32xbf16> to vector<1x16x32xbf16>
      tpu.vector_store %arg15[%c3_150, %c0_151, %c0_152], %232 {strides = array<i32>} : memref<4x16x32xbf16, #tpu.memory_space<vmem>>, vector<1x16x32xbf16>,
      %c3_153 = arith.constant 3 : index
      %c0_154 = arith.constant 0 : index
      %c0_155 = arith.constant 0 : index
      %233 = vector.load %arg6[%c3_153, %c0_154, %c0_155] : memref<4x128x32xbf16, #tpu.memory_space<vmem>>, vector<1x128x32xbf16>
      %234 = vector.shape_cast %233 : vector<1x128x32xbf16> to vector<128x32xbf16>
      %cst_156 = arith.constant dense<0.000000e+00> : vector<16x32xf32>
      %235 = tpu.matmul %183, %234, %cst_156 {dimension_numbers = #tpu.dot_dimension_numbers<[1], [0], [0], [1], [0, 0, 1, 1], [], []>} : vector<16x128xbf16>, vector<128x32xbf16>, vector<16x32xf32> -> vector<16x32xf32>
      %236 = arith.truncf %235 : vector<16x32xf32> to vector<16x32xbf16>
      %c3_157 = arith.constant 3 : index
      %c0_158 = arith.constant 0 : index
      %c0_159 = arith.constant 0 : index
      %237 = vector.load %arg16[%c3_157, %c0_158, %c0_159] : memref<4x16x32xbf16, #tpu.memory_space<vmem>>, vector<1x16x32xbf16>
      %238 = vector.shape_cast %237 : vector<1x16x32xbf16> to vector<16x32xbf16>
      %239 = vector.shape_cast %236 : vector<16x32xbf16> to vector<1x16x32xbf16>
      tpu.vector_store %arg16[%c3_157, %c0_158, %c0_159], %239 {strides = array<i32>} : memref<4x16x32xbf16, #tpu.memory_space<vmem>>, vector<1x16x32xbf16>,
    } else {
    }
    %c16_i32 = arith.constant 16 : i32
    %3 = arith.muli %arg1, %c16_i32 : i32
    %4 = tpu.assume_multiple %3, 16 : i32
    %c0 = arith.constant 0 : index
    %5 = arith.index_cast %4 : i32 to index
    %c0_1 = arith.constant 0 : index
    %6 = vector.load %arg2[%c0, %5, %c0_1] : memref<1x16x128xf32, #tpu.memory_space<vmem>>, vector<1x16x128xf32>
    %7 = vector.shape_cast %6 : vector<1x16x128xf32> to vector<16x128xf32>
    %8 = arith.truncf %7 : vector<16x128xf32> to vector<16x128xbf16>
    %c0_2 = arith.constant 0 : index
    %c0_3 = arith.constant 0 : index
    %9 = vector.load %arg3[%c0_2, %c0_3] : memref<16x16xbf16, #tpu.memory_space<vmem>>, vector<16x16xbf16>
    %10 = arith.extf %9 : vector<16x16xbf16> to vector<16x16xf32>
    %cst = arith.constant 0.000000e+00 : f32
    %11 = vector.broadcast %cst : f32 to vector<16x128xf32>
    %c0_4 = arith.constant 0 : index
    %c0_5 = arith.constant 0 : index
    %c0_6 = arith.constant 0 : index
    %12 = vector.load %arg4[%c0_4, %c0_5, %c0_6] : memref<4x128x32xbf16, #tpu.memory_space<vmem>>, vector<1x128x32xbf16>
    %13 = vector.shape_cast %12 : vector<1x128x32xbf16> to vector<128x32xbf16>
    %cst_7 = arith.constant dense<0.000000e+00> : vector<16x32xf32>
    %14 = tpu.matmul %8, %13, %cst_7 {dimension_numbers = #tpu.dot_dimension_numbers<[1], [0], [0], [1], [0, 0, 1, 1], [], []>} : vector<16x128xbf16>, vector<128x32xbf16>, vector<16x32xf32> -> vector<16x32xf32>
    %15 = arith.truncf %14 : vector<16x32xf32> to vector<16x32xbf16>
    %c0_8 = arith.constant 0 : index
    %c0_9 = arith.constant 0 : index
    %c0_10 = arith.constant 0 : index
    %16 = vector.load %arg15[%c0_8, %c0_9, %c0_10] : memref<4x16x32xbf16, #tpu.memory_space<vmem>>, vector<1x16x32xbf16>
    %17 = vector.shape_cast %16 : vector<1x16x32xbf16> to vector<16x32xbf16>
    "tpu.trace_start"() <{level = 10 : i32, message = "qd,kd->qk"}> : () -> ()
    %cst_11 = arith.constant dense<0.000000e+00> : vector<16x16xf32>
    %18 = tpu.matmul %15, %17, %cst_11 {dimension_numbers = #tpu.dot_dimension_numbers<[1], [1], [0], [0], [0, 0, 1, 0], [], []>} : vector<16x32xbf16>, vector<16x32xbf16>, vector<16x16xf32> -> vector<16x16xf32>
    "tpu.trace_stop"() : () -> ()
    %19 = arith.addf %18, %10 : vector<16x16xf32>
    %cst_12 = arith.constant dense<0xFF800000> : vector<16xf32>
    %20 = vector.multi_reduction <maximumf>, %19, %cst_12 [1] : vector<16x16xf32> to vector<16xf32>
    %21 = vector.shape_cast %20 : vector<16xf32> to vector<16x1xf32>
    %22 = vector.broadcast %21 : vector<16x1xf32> to vector<16x16xf32>
    %23 = arith.subf %19, %22 : vector<16x16xf32>
    %24 = math.exp %23 : vector<16x16xf32>
    %cst_13 = arith.constant dense<0.000000e+00> : vector<16xf32>
    %25 = vector.multi_reduction <add>, %24, %cst_13 [1] : vector<16x16xf32> to vector<16xf32>
    %26 = vector.shape_cast %25 : vector<16xf32> to vector<16x1xf32>
    %27 = tpu.reciprocal %26 {approx = true} : vector<16x1xf32> -> vector<16x1xf32>
    %28 = vector.broadcast %27 : vector<16x1xf32> to vector<16x16xf32>
    %29 = arith.mulf %24, %28 : vector<16x16xf32>
    %30 = arith.truncf %29 : vector<16x16xf32> to vector<16x16xbf16>
    %c0_14 = arith.constant 0 : index
    %c0_15 = arith.constant 0 : index
    %c0_16 = arith.constant 0 : index
    %31 = vector.load %arg16[%c0_14, %c0_15, %c0_16] : memref<4x16x32xbf16, #tpu.memory_space<vmem>>, vector<1x16x32xbf16>
    %32 = vector.shape_cast %31 : vector<1x16x32xbf16> to vector<16x32xbf16>
    %cst_17 = arith.constant dense<0.000000e+00> : vector<16x32xf32>
    %33 = tpu.matmul %30, %32, %cst_17 {dimension_numbers = #tpu.dot_dimension_numbers<[1], [0], [0], [1], [0, 0, 1, 1], [], []>} : vector<16x16xbf16>, vector<16x32xbf16>, vector<16x32xf32> -> vector<16x32xf32>
    %34 = arith.truncf %33 : vector<16x32xf32> to vector<16x32xbf16>
    %c0_18 = arith.constant 0 : index
    %c0_19 = arith.constant 0 : index
    %c0_20 = arith.constant 0 : index
    %35 = vector.load %arg7[%c0_18, %c0_19, %c0_20] : memref<4x32x128xbf16, #tpu.memory_space<vmem>>, vector<1x32x128xbf16>
    %36 = vector.shape_cast %35 : vector<1x32x128xbf16> to vector<32x128xbf16>
    %cst_21 = arith.constant dense<0.000000e+00> : vector<16x128xf32>
    %37 = tpu.matmul %34, %36, %cst_21 {dimension_numbers = #tpu.dot_dimension_numbers<[1], [0], [0], [1], [0, 0, 1, 1], [], []>} : vector<16x32xbf16>, vector<32x128xbf16>, vector<16x128xf32> -> vector<16x128xf32>
    %38 = arith.addf %11, %37 : vector<16x128xf32>
    %c1 = arith.constant 1 : index
    %c0_22 = arith.constant 0 : index
    %c0_23 = arith.constant 0 : index
    %39 = vector.load %arg4[%c1, %c0_22, %c0_23] : memref<4x128x32xbf16, #tpu.memory_space<vmem>>, vector<1x128x32xbf16>
    %40 = vector.shape_cast %39 : vector<1x128x32xbf16> to vector<128x32xbf16>
    %cst_24 = arith.constant dense<0.000000e+00> : vector<16x32xf32>
    %41 = tpu.matmul %8, %40, %cst_24 {dimension_numbers = #tpu.dot_dimension_numbers<[1], [0], [0], [1], [0, 0, 1, 1], [], []>} : vector<16x128xbf16>, vector<128x32xbf16>, vector<16x32xf32> -> vector<16x32xf32>
    %42 = arith.truncf %41 : vector<16x32xf32> to vector<16x32xbf16>
    %c1_25 = arith.constant 1 : index
    %c0_26 = arith.constant 0 : index
    %c0_27 = arith.constant 0 : index
    %43 = vector.load %arg15[%c1_25, %c0_26, %c0_27] : memref<4x16x32xbf16, #tpu.memory_space<vmem>>, vector<1x16x32xbf16>
    %44 = vector.shape_cast %43 : vector<1x16x32xbf16> to vector<16x32xbf16>
    "tpu.trace_start"() <{level = 10 : i32, message = "qd,kd->qk"}> : () -> ()
    %cst_28 = arith.constant dense<0.000000e+00> : vector<16x16xf32>
    %45 = tpu.matmul %42, %44, %cst_28 {dimension_numbers = #tpu.dot_dimension_numbers<[1], [1], [0], [0], [0, 0, 1, 0], [], []>} : vector<16x32xbf16>, vector<16x32xbf16>, vector<16x16xf32> -> vector<16x16xf32>
    "tpu.trace_stop"() : () -> ()
    %46 = arith.addf %45, %10 : vector<16x16xf32>
    %cst_29 = arith.constant dense<0xFF800000> : vector<16xf32>
    %47 = vector.multi_reduction <maximumf>, %46, %cst_29 [1] : vector<16x16xf32> to vector<16xf32>
    %48 = vector.shape_cast %47 : vector<16xf32> to vector<16x1xf32>
    %49 = vector.broadcast %48 : vector<16x1xf32> to vector<16x16xf32>
    %50 = arith.subf %46, %49 : vector<16x16xf32>
    %51 = math.exp %50 : vector<16x16xf32>
    %cst_30 = arith.constant dense<0.000000e+00> : vector<16xf32>
    %52 = vector.multi_reduction <add>, %51, %cst_30 [1] : vector<16x16xf32> to vector<16xf32>
    %53 = vector.shape_cast %52 : vector<16xf32> to vector<16x1xf32>
    %54 = tpu.reciprocal %53 {approx = true} : vector<16x1xf32> -> vector<16x1xf32>
    %55 = vector.broadcast %54 : vector<16x1xf32> to vector<16x16xf32>
    %56 = arith.mulf %51, %55 : vector<16x16xf32>
    %57 = arith.truncf %56 : vector<16x16xf32> to vector<16x16xbf16>
    %c1_31 = arith.constant 1 : index
    %c0_32 = arith.constant 0 : index
    %c0_33 = arith.constant 0 : index
    %58 = vector.load %arg16[%c1_31, %c0_32, %c0_33] : memref<4x16x32xbf16, #tpu.memory_space<vmem>>, vector<1x16x32xbf16>
    %59 = vector.shape_cast %58 : vector<1x16x32xbf16> to vector<16x32xbf16>
    %cst_34 = arith.constant dense<0.000000e+00> : vector<16x32xf32>
    %60 = tpu.matmul %57, %59, %cst_34 {dimension_numbers = #tpu.dot_dimension_numbers<[1], [0], [0], [1], [0, 0, 1, 1], [], []>} : vector<16x16xbf16>, vector<16x32xbf16>, vector<16x32xf32> -> vector<16x32xf32>
    %61 = arith.truncf %60 : vector<16x32xf32> to vector<16x32xbf16>
    %c1_35 = arith.constant 1 : index
    %c0_36 = arith.constant 0 : index
    %c0_37 = arith.constant 0 : index
    %62 = vector.load %arg7[%c1_35, %c0_36, %c0_37] : memref<4x32x128xbf16, #tpu.memory_space<vmem>>, vector<1x32x128xbf16>
    %63 = vector.shape_cast %62 : vector<1x32x128xbf16> to vector<32x128xbf16>
    %cst_38 = arith.constant dense<0.000000e+00> : vector<16x128xf32>
    %64 = tpu.matmul %61, %63, %cst_38 {dimension_numbers = #tpu.dot_dimension_numbers<[1], [0], [0], [1], [0, 0, 1, 1], [], []>} : vector<16x32xbf16>, vector<32x128xbf16>, vector<16x128xf32> -> vector<16x128xf32>
    %65 = arith.addf %38, %64 : vector<16x128xf32>
    %c2 = arith.constant 2 : index
    %c0_39 = arith.constant 0 : index
    %c0_40 = arith.constant 0 : index
    %66 = vector.load %arg4[%c2, %c0_39, %c0_40] : memref<4x128x32xbf16, #tpu.memory_space<vmem>>, vector<1x128x32xbf16>
    %67 = vector.shape_cast %66 : vector<1x128x32xbf16> to vector<128x32xbf16>
    %cst_41 = arith.constant dense<0.000000e+00> : vector<16x32xf32>
    %68 = tpu.matmul %8, %67, %cst_41 {dimension_numbers = #tpu.dot_dimension_numbers<[1], [0], [0], [1], [0, 0, 1, 1], [], []>} : vector<16x128xbf16>, vector<128x32xbf16>, vector<16x32xf32> -> vector<16x32xf32>
    %69 = arith.truncf %68 : vector<16x32xf32> to vector<16x32xbf16>
    %c2_42 = arith.constant 2 : index
    %c0_43 = arith.constant 0 : index
    %c0_44 = arith.constant 0 : index
    %70 = vector.load %arg15[%c2_42, %c0_43, %c0_44] : memref<4x16x32xbf16, #tpu.memory_space<vmem>>, vector<1x16x32xbf16>
    %71 = vector.shape_cast %70 : vector<1x16x32xbf16> to vector<16x32xbf16>
    "tpu.trace_start"() <{level = 10 : i32, message = "qd,kd->qk"}> : () -> ()
    %cst_45 = arith.constant dense<0.000000e+00> : vector<16x16xf32>
    %72 = tpu.matmul %69, %71, %cst_45 {dimension_numbers = #tpu.dot_dimension_numbers<[1], [1], [0], [0], [0, 0, 1, 0], [], []>} : vector<16x32xbf16>, vector<16x32xbf16>, vector<16x16xf32> -> vector<16x16xf32>
    "tpu.trace_stop"() : () -> ()
    %73 = arith.addf %72, %10 : vector<16x16xf32>
    %cst_46 = arith.constant dense<0xFF800000> : vector<16xf32>
    %74 = vector.multi_reduction <maximumf>, %73, %cst_46 [1] : vector<16x16xf32> to vector<16xf32>
    %75 = vector.shape_cast %74 : vector<16xf32> to vector<16x1xf32>
    %76 = vector.broadcast %75 : vector<16x1xf32> to vector<16x16xf32>
    %77 = arith.subf %73, %76 : vector<16x16xf32>
    %78 = math.exp %77 : vector<16x16xf32>
    %cst_47 = arith.constant dense<0.000000e+00> : vector<16xf32>
    %79 = vector.multi_reduction <add>, %78, %cst_47 [1] : vector<16x16xf32> to vector<16xf32>
    %80 = vector.shape_cast %79 : vector<16xf32> to vector<16x1xf32>
    %81 = tpu.reciprocal %80 {approx = true} : vector<16x1xf32> -> vector<16x1xf32>
    %82 = vector.broadcast %81 : vector<16x1xf32> to vector<16x16xf32>
    %83 = arith.mulf %78, %82 : vector<16x16xf32>
    %84 = arith.truncf %83 : vector<16x16xf32> to vector<16x16xbf16>
    %c2_48 = arith.constant 2 : index
    %c0_49 = arith.constant 0 : index
    %c0_50 = arith.constant 0 : index
    %85 = vector.load %arg16[%c2_48, %c0_49, %c0_50] : memref<4x16x32xbf16, #tpu.memory_space<vmem>>, vector<1x16x32xbf16>
    %86 = vector.shape_cast %85 : vector<1x16x32xbf16> to vector<16x32xbf16>
    %cst_51 = arith.constant dense<0.000000e+00> : vector<16x32xf32>
    %87 = tpu.matmul %84, %86, %cst_51 {dimension_numbers = #tpu.dot_dimension_numbers<[1], [0], [0], [1], [0, 0, 1, 1], [], []>} : vector<16x16xbf16>, vector<16x32xbf16>, vector<16x32xf32> -> vector<16x32xf32>
    %88 = arith.truncf %87 : vector<16x32xf32> to vector<16x32xbf16>
    %c2_52 = arith.constant 2 : index
    %c0_53 = arith.constant 0 : index
    %c0_54 = arith.constant 0 : index
    %89 = vector.load %arg7[%c2_52, %c0_53, %c0_54] : memref<4x32x128xbf16, #tpu.memory_space<vmem>>, vector<1x32x128xbf16>
    %90 = vector.shape_cast %89 : vector<1x32x128xbf16> to vector<32x128xbf16>
    %cst_55 = arith.constant dense<0.000000e+00> : vector<16x128xf32>
    %91 = tpu.matmul %88, %90, %cst_55 {dimension_numbers = #tpu.dot_dimension_numbers<[1], [0], [0], [1], [0, 0, 1, 1], [], []>} : vector<16x32xbf16>, vector<32x128xbf16>, vector<16x128xf32> -> vector<16x128xf32>
    %92 = arith.addf %65, %91 : vector<16x128xf32>
    %c3 = arith.constant 3 : index
    %c0_56 = arith.constant 0 : index
    %c0_57 = arith.constant 0 : index
    %93 = vector.load %arg4[%c3, %c0_56, %c0_57] : memref<4x128x32xbf16, #tpu.memory_space<vmem>>, vector<1x128x32xbf16>
    %94 = vector.shape_cast %93 : vector<1x128x32xbf16> to vector<128x32xbf16>
    %cst_58 = arith.constant dense<0.000000e+00> : vector<16x32xf32>
    %95 = tpu.matmul %8, %94, %cst_58 {dimension_numbers = #tpu.dot_dimension_numbers<[1], [0], [0], [1], [0, 0, 1, 1], [], []>} : vector<16x128xbf16>, vector<128x32xbf16>, vector<16x32xf32> -> vector<16x32xf32>
    %96 = arith.truncf %95 : vector<16x32xf32> to vector<16x32xbf16>
    %c3_59 = arith.constant 3 : index
    %c0_60 = arith.constant 0 : index
    %c0_61 = arith.constant 0 : index
    %97 = vector.load %arg15[%c3_59, %c0_60, %c0_61] : memref<4x16x32xbf16, #tpu.memory_space<vmem>>, vector<1x16x32xbf16>
    %98 = vector.shape_cast %97 : vector<1x16x32xbf16> to vector<16x32xbf16>
    "tpu.trace_start"() <{level = 10 : i32, message = "qd,kd->qk"}> : () -> ()
    %cst_62 = arith.constant dense<0.000000e+00> : vector<16x16xf32>
    %99 = tpu.matmul %96, %98, %cst_62 {dimension_numbers = #tpu.dot_dimension_numbers<[1], [1], [0], [0], [0, 0, 1, 0], [], []>} : vector<16x32xbf16>, vector<16x32xbf16>, vector<16x16xf32> -> vector<16x16xf32>
    "tpu.trace_stop"() : () -> ()
    %100 = arith.addf %99, %10 : vector<16x16xf32>
    %cst_63 = arith.constant dense<0xFF800000> : vector<16xf32>
    %101 = vector.multi_reduction <maximumf>, %100, %cst_63 [1] : vector<16x16xf32> to vector<16xf32>
    %102 = vector.shape_cast %101 : vector<16xf32> to vector<16x1xf32>
    %103 = vector.broadcast %102 : vector<16x1xf32> to vector<16x16xf32>
    %104 = arith.subf %100, %103 : vector<16x16xf32>
    %105 = math.exp %104 : vector<16x16xf32>
    %cst_64 = arith.constant dense<0.000000e+00> : vector<16xf32>
    %106 = vector.multi_reduction <add>, %105, %cst_64 [1] : vector<16x16xf32> to vector<16xf32>
    %107 = vector.shape_cast %106 : vector<16xf32> to vector<16x1xf32>
    %108 = tpu.reciprocal %107 {approx = true} : vector<16x1xf32> -> vector<16x1xf32>
    %109 = vector.broadcast %108 : vector<16x1xf32> to vector<16x16xf32>
    %110 = arith.mulf %105, %109 : vector<16x16xf32>
    %111 = arith.truncf %110 : vector<16x16xf32> to vector<16x16xbf16>
    %c3_65 = arith.constant 3 : index
    %c0_66 = arith.constant 0 : index
    %c0_67 = arith.constant 0 : index
    %112 = vector.load %arg16[%c3_65, %c0_66, %c0_67] : memref<4x16x32xbf16, #tpu.memory_space<vmem>>, vector<1x16x32xbf16>
    %113 = vector.shape_cast %112 : vector<1x16x32xbf16> to vector<16x32xbf16>
    %cst_68 = arith.constant dense<0.000000e+00> : vector<16x32xf32>
    %114 = tpu.matmul %111, %113, %cst_68 {dimension_numbers = #tpu.dot_dimension_numbers<[1], [0], [0], [1], [0, 0, 1, 1], [], []>} : vector<16x16xbf16>, vector<16x32xbf16>, vector<16x32xf32> -> vector<16x32xf32>
    %115 = arith.truncf %114 : vector<16x32xf32> to vector<16x32xbf16>
    %c3_69 = arith.constant 3 : index
    %c0_70 = arith.constant 0 : index
    %c0_71 = arith.constant 0 : index
    %116 = vector.load %arg7[%c3_69, %c0_70, %c0_71] : memref<4x32x128xbf16, #tpu.memory_space<vmem>>, vector<1x32x128xbf16>
    %117 = vector.shape_cast %116 : vector<1x32x128xbf16> to vector<32x128xbf16>
    %cst_72 = arith.constant dense<0.000000e+00> : vector<16x128xf32>
    %118 = tpu.matmul %115, %117, %cst_72 {dimension_numbers = #tpu.dot_dimension_numbers<[1], [0], [0], [1], [0, 0, 1, 1], [], []>} : vector<16x32xbf16>, vector<32x128xbf16>, vector<16x128xf32> -> vector<16x128xf32>
    %119 = arith.addf %92, %118 : vector<16x128xf32>
    %120 = arith.addf %7, %119 : vector<16x128xf32>
    %cst_73 = arith.constant dense<0.000000e+00> : vector<16xf32>
    %121 = vector.multi_reduction <add>, %120, %cst_73 [1] : vector<16x128xf32> to vector<16xf32>
    %122 = vector.shape_cast %121 : vector<16xf32> to vector<16x1xf32>
    %cst_74 = arith.constant 1.280000e+02 : f32
    %123 = vector.broadcast %cst_74 : f32 to vector<16x1xf32>
    %124 = arith.divf %122, %123 : vector<16x1xf32>
    %125 = vector.broadcast %124 : vector<16x1xf32> to vector<16x128xf32>
    %126 = arith.subf %120, %125 : vector<16x128xf32>
    %127 = arith.mulf %126, %126 : vector<16x128xf32>
    %cst_75 = arith.constant dense<0.000000e+00> : vector<16xf32>
    %128 = vector.multi_reduction <add>, %127, %cst_75 [1] : vector<16x128xf32> to vector<16xf32>
    %129 = vector.shape_cast %128 : vector<16xf32> to vector<16x1xf32>
    %cst_76 = arith.constant 1.280000e+02 : f32
    %130 = vector.broadcast %cst_76 : f32 to vector<16x1xf32>
    %131 = arith.divf %129, %130 : vector<16x1xf32>
    %132 = vector.broadcast %124 : vector<16x1xf32> to vector<16x128xf32>
    %133 = arith.subf %120, %132 : vector<16x128xf32>
    %cst_77 = arith.constant 9.99999974E-6 : f32
    %134 = vector.broadcast %cst_77 : f32 to vector<16x1xf32>
    %135 = arith.addf %131, %134 : vector<16x1xf32>
    %136 = math.rsqrt %135 : vector<16x1xf32>
    %137 = vector.broadcast %136 : vector<16x1xf32> to vector<16x128xf32>
    %138 = arith.mulf %133, %137 : vector<16x128xf32>
    %c0_78 = arith.constant 0 : index
    %c0_79 = arith.constant 0 : index
    %139 = vector.load %arg8[%c0_78, %c0_79] : memref<1x128xf32, #tpu.memory_space<vmem>>, vector<1x128xf32>
    %140 = vector.broadcast %139 : vector<1x128xf32> to vector<16x128xf32>
    %141 = arith.mulf %138, %140 : vector<16x128xf32>
    %c0_80 = arith.constant 0 : index
    %c0_81 = arith.constant 0 : index
    %142 = vector.load %arg9[%c0_80, %c0_81] : memref<1x128xf32, #tpu.memory_space<vmem>>, vector<1x128xf32>
    %143 = vector.broadcast %142 : vector<1x128xf32> to vector<16x128xf32>
    %144 = arith.addf %141, %143 : vector<16x128xf32>
    %145 = arith.truncf %144 : vector<16x128xf32> to vector<16x128xbf16>
    %c0_82 = arith.constant 0 : index
    %c0_83 = arith.constant 0 : index
    %146 = vector.load %arg10[%c0_82, %c0_83] : memref<128x256xbf16, #tpu.memory_space<vmem>>, vector<128x256xbf16>
    %cst_84 = arith.constant dense<0.000000e+00> : vector<16x256xf32>
    %147 = tpu.matmul %145, %146, %cst_84 {dimension_numbers = #tpu.dot_dimension_numbers<[1], [0], [0], [1], [0, 0, 1, 1], [], []>} : vector<16x128xbf16>, vector<128x256xbf16>, vector<16x256xf32> -> vector<16x256xf32>
    %cst_85 = arith.constant 0.000000e+00 : f32
    %148 = vector.broadcast %cst_85 : f32 to vector<16x256xf32>
    %149 = arith.maximumf %147, %148 : vector<16x256xf32>
    %150 = arith.truncf %149 : vector<16x256xf32> to vector<16x256xbf16>
    %c0_86 = arith.constant 0 : index
    %c0_87 = arith.constant 0 : index
    %151 = vector.load %arg11[%c0_86, %c0_87] : memref<256x128xbf16, #tpu.memory_space<vmem>>, vector<256x128xbf16>
    %cst_88 = arith.constant dense<0.000000e+00> : vector<16x128xf32>
    %152 = tpu.matmul %150, %151, %cst_88 {dimension_numbers = #tpu.dot_dimension_numbers<[1], [0], [0], [1], [0, 0, 1, 1], [], []>} : vector<16x256xbf16>, vector<256x128xbf16>, vector<16x128xf32> -> vector<16x128xf32>
    %153 = arith.addf %144, %152 : vector<16x128xf32>
    %cst_89 = arith.constant dense<0.000000e+00> : vector<16xf32>
    %154 = vector.multi_reduction <add>, %153, %cst_89 [1] : vector<16x128xf32> to vector<16xf32>
    %155 = vector.shape_cast %154 : vector<16xf32> to vector<16x1xf32>
    %cst_90 = arith.constant 1.280000e+02 : f32
    %156 = vector.broadcast %cst_90 : f32 to vector<16x1xf32>
    %157 = arith.divf %155, %156 : vector<16x1xf32>
    %158 = vector.broadcast %157 : vector<16x1xf32> to vector<16x128xf32>
    %159 = arith.subf %153, %158 : vector<16x128xf32>
    %160 = arith.mulf %159, %159 : vector<16x128xf32>
    %cst_91 = arith.constant dense<0.000000e+00> : vector<16xf32>
    %161 = vector.multi_reduction <add>, %160, %cst_91 [1] : vector<16x128xf32> to vector<16xf32>
    %162 = vector.shape_cast %161 : vector<16xf32> to vector<16x1xf32>
    %cst_92 = arith.constant 1.280000e+02 : f32
    %163 = vector.broadcast %cst_92 : f32 to vector<16x1xf32>
    %164 = arith.divf %162, %163 : vector<16x1xf32>
    %165 = vector.broadcast %157 : vector<16x1xf32> to vector<16x128xf32>
    %166 = arith.subf %153, %165 : vector<16x128xf32>
    %cst_93 = arith.constant 9.99999974E-6 : f32
    %167 = vector.broadcast %cst_93 : f32 to vector<16x1xf32>
    %168 = arith.addf %164, %167 : vector<16x1xf32>
    %169 = math.rsqrt %168 : vector<16x1xf32>
    %170 = vector.broadcast %169 : vector<16x1xf32> to vector<16x128xf32>
    %171 = arith.mulf %166, %170 : vector<16x128xf32>
    %c0_94 = arith.constant 0 : index
    %c0_95 = arith.constant 0 : index
    %172 = vector.load %arg12[%c0_94, %c0_95] : memref<1x128xf32, #tpu.memory_space<vmem>>, vector<1x128xf32>
    %173 = vector.broadcast %172 : vector<1x128xf32> to vector<16x128xf32>
    %174 = arith.mulf %171, %173 : vector<16x128xf32>
    %c0_96 = arith.constant 0 : index
    %c0_97 = arith.constant 0 : index
    %175 = vector.load %arg13[%c0_96, %c0_97] : memref<1x128xf32, #tpu.memory_space<vmem>>, vector<1x128xf32>
    %176 = vector.broadcast %175 : vector<1x128xf32> to vector<16x128xf32>
    %177 = arith.addf %174, %176 : vector<16x128xf32>
    %c0_98 = arith.constant 0 : index
    %c0_99 = arith.constant 0 : index
    %c0_100 = arith.constant 0 : index
    %178 = vector.load %arg14[%c0_98, %c0_99, %c0_100] : memref<1x16x128xf32, #tpu.memory_space<vmem>>, vector<1x16x128xf32>
    %179 = vector.shape_cast %178 : vector<1x16x128xf32> to vector<16x128xf32>
    %180 = vector.shape_cast %177 : vector<16x128xf32> to vector<1x16x128xf32>
    tpu.vector_store %arg14[%c0_98, %c0_99, %c0_100], %180 {strides = array<i32>} : memref<1x16x128xf32, #tpu.memory_space<vmem>>, vector<1x16x128xf32>,
    return
  }
  func.func @transform_0(%arg0: i32, %arg1: i32) -> (i32, i32, i32) {
    %c0_i32 = arith.constant 0 : i32
    %c0_i32_0 = arith.constant 0 : i32
    %c0_i32_1 = arith.constant 0 : i32
    return %arg0, %c0_i32, %c0_i32_0 : i32, i32, i32
  }
  func.func @transform_1(%arg0: i32, %arg1: i32) -> (i32, i32) {
    %c0_i32 = arith.constant 0 : i32
    %c0_i32_0 = arith.constant 0 : i32
    return %arg1, %c0_i32 : i32, i32
  }
  func.func @transform_2(%arg0: i32, %arg1: i32) -> (i32, i32, i32) {
    %c0_i32 = arith.constant 0 : i32
    %c0_i32_0 = arith.constant 0 : i32
    %c0_i32_1 = arith.constant 0 : i32
    %c0_i32_2 = arith.constant 0 : i32
    return %c0_i32, %c0_i32_0, %c0_i32_1 : i32, i32, i32
  }
  func.func @transform_3(%arg0: i32, %arg1: i32) -> (i32, i32, i32) {
    %c0_i32 = arith.constant 0 : i32
    %c0_i32_0 = arith.constant 0 : i32
    %c0_i32_1 = arith.constant 0 : i32
    %c0_i32_2 = arith.constant 0 : i32
    return %c0_i32, %c0_i32_0, %c0_i32_1 : i32, i32, i32
  }
  func.func @transform_4(%arg0: i32, %arg1: i32) -> (i32, i32, i32) {
    %c0_i32 = arith.constant 0 : i32
    %c0_i32_0 = arith.constant 0 : i32
    %c0_i32_1 = arith.constant 0 : i32
    %c0_i32_2 = arith.constant 0 : i32
    return %c0_i32, %c0_i32_0, %c0_i32_1 : i32, i32, i32
  }
  func.func @transform_5(%arg0: i32, %arg1: i32) -> (i32, i32, i32) {
    %c0_i32 = arith.constant 0 : i32
    %c0_i32_0 = arith.constant 0 : i32
    %c0_i32_1 = arith.constant 0 : i32
    %c0_i32_2 = arith.constant 0 : i32
    return %c0_i32, %c0_i32_0, %c0_i32_1 : i32, i32, i32
  }
  func.func @transform_6(%arg0: i32, %arg1: i32) -> (i32, i32) {
    %c0_i32 = arith.constant 0 : i32
    %c0_i32_0 = arith.constant 0 : i32
    %c0_i32_1 = arith.constant 0 : i32
    return %c0_i32, %c0_i32_0 : i32, i32
  }
  func.func @transform_7(%arg0: i32, %arg1: i32) -> (i32, i32) {
    %c0_i32 = arith.constant 0 : i32
    %c0_i32_0 = arith.constant 0 : i32
    %c0_i32_1 = arith.constant 0 : i32
    return %c0_i32, %c0_i32_0 : i32, i32
  }
  func.func @transform_8(%arg0: i32, %arg1: i32) -> (i32, i32) {
    %c0_i32 = arith.constant 0 : i32
    %c0_i32_0 = arith.constant 0 : i32
    %c0_i32_1 = arith.constant 0 : i32
    return %c0_i32, %c0_i32_0 : i32, i32
  }
  func.func @transform_9(%arg0: i32, %arg1: i32) -> (i32, i32) {
    %c0_i32 = arith.constant 0 : i32
    %c0_i32_0 = arith.constant 0 : i32
    %c0_i32_1 = arith.constant 0 : i32
    return %c0_i32, %c0_i32_0 : i32, i32
  }
  func.func @transform_10(%arg0: i32, %arg1: i32) -> (i32, i32) {
    %c0_i32 = arith.constant 0 : i32
    %c0_i32_0 = arith.constant 0 : i32
    %c0_i32_1 = arith.constant 0 : i32
    return %c0_i32, %c0_i32_0 : i32, i32
  }
  func.func @transform_11(%arg0: i32, %arg1: i32) -> (i32, i32) {
    %c0_i32 = arith.constant 0 : i32
    %c0_i32_0 = arith.constant 0 : i32
    %c0_i32_1 = arith.constant 0 : i32
    return %c0_i32, %c0_i32_0 : i32, i32
  }
  func.func @transform_12(%arg0: i32, %arg1: i32) -> (i32, i32, i32) {
    %c0_i32 = arith.constant 0 : i32
    %c0_i32_0 = arith.constant 0 : i32
    return %arg0, %arg1, %c0_i32 : i32, i32, i32
  }
}

</mosaic_0001>

<bundles_post_ra>
// kernel: tpu_custom_call.1
= control target key start
LH: loop header
LB: loop body
LE: loop exit
PB: predicated region body
PF: predicated region fallthrough
CT: control target
= control target key end

     0   :  { %s4988_s0 = inlined_call_operand.vmem [shape: f32[2,16,128], index: 0, kind: input, shape index: {}]   ;;  %s4989_s1 = inlined_call_operand.vmem [shape: bf16[16,16], index: 1, kind: input, shape index: {}]   ;;  %s4990_s2 = inlined_call_operand.vmem [shape: bf16[4,128,32], index: 2, kind: input, shape index: {}]   ;;  %s4991_s3 = inlined_call_operand.vmem [shape: bf16[4,128,32], index: 3, kind: input, shape index: {}]   ;;  %s4992_s4 = inlined_call_operand.vmem [shape: bf16[4,128,32], index: 4, kind: input, shape index: {}]   ;;  %s4993_s5 = inlined_call_operand.vmem [shape: bf16[4,32,128], index: 5, kind: input, shape index: {}]   ;;  %s4994_s6 = inlined_call_operand.vmem [shape: f32[1,128], index: 6, kind: input, shape index: {}]   ;;  %s4995_s7 = inlined_call_operand.vmem [shape: f32[1,128], index: 7, kind: input, shape index: {}]   ;;  %s4996_s8 = inlined_call_operand.vmem [shape: bf16[128,256], index: 8, kind: input, shape index: {}]   ;;  %s4997_s9 = inlined_call_operand.vmem [shape: bf16[256,128], index: 9, kind: input, shape index: {}]   ;;  %s4998_s10 = inlined_call_operand.vmem [shape: f32[1,128], index: 10, kind: input, shape index: {}]   ;;  %s4999_s11 = inlined_call_operand.vmem [shape: f32[1,128], index: 11, kind: input, shape index: {}]   ;;  %s5000_s12 = inlined_call_operand.hbm [shape: f32[2,16,128], index: 12, kind: output, shape index: {}]  }
   0x1   :  { %5003 = sst [smem:[#allocation9_spill]] %s4988_s0 }
   0x2   :  { %5004 = sst [smem:[#allocation10_spill]] %s4989_s1 }
   0x3   :  { %17 = vsyncpa [#allocation5], 0 }
   0x4   :  { %19 = vsyncpa [#allocation5 + $0x1], 0  ;;  %s4196_s21 = smov 0   ;;  %s4198_s22 = smov 0  }
   0x5   :  { %s4200_s23 = smov 0   ;;  %s4202_s24 = smov 0  }
   0x6   :  { %s4204_s25 = smov 0   ;;  %s4206_s26 = smov 0  }
   0x7 LB: > { %5005 = sst [smem:[#allocation7_spill]] %s4119_s25  ;;  %s2993_s27 = sadd.s32 4294967295, %s4123_s26   ;;  %s4123_s26 = sphi %s4206_s26, %s25_s26   ;;  %s4119_s25 = sphi %s4204_s25, %s5012_s25   ;;  %s4115_s24 = sphi %s4202_s24, %s5011_s24   ;;  %s4111_s23 = sphi %s4200_s23, %s5015_s23   ;;  %s4107_s22 = sphi %s4198_s22, %s5014_s22   ;;  %s4103_s21 = sphi %s4196_s21, %s5013_s21  }
   0x8   : > { %s2994_s28 = sadd.s32 4294967294, %s4123_s26   ;;  %s37_s29 = sadd.s32 1, %s4119_s25 }
   0x9   : > { %s308_s30 = sadd.s32 1, %s4111_s23  ;;  %p39_p0 = scmp.ge.s32.totalorder %s37_s29, 2 }
   0xa   : > { %p318_p1 = scmp.ne.s32.totalorder %s4111_s23, %s4107_s22  ;;  %p319_p2 = scmp.eq.s32.totalorder %s2993_s27, 1 }
   0xb   : > { %p324_p3 = scmp.ne.s32.totalorder %s4107_s22, %s4103_s21  ;;  %s5017_s29 = smov (%p39_p0, %s37_s29), 0 }
   0xc   : > { %5006 = sst [smem:[#allocation8_spill]] %s5017_s29  ;;  %p4236_p4 = por %p319_p2, %p318_p1 }
   0xd   : > { %p325_p5 = scmp.eq.s32.totalorder %s2994_s28, 1  ;;  %s303_s14 = ssub.s32 %s4119_s25, %s5017_s29 }
   0xe   : > { %p2998_p6 = scmp.ge.s32.totalorder %s4123_s26, 1  ;;  %p306_p7 = scmp.eq.s32.totalorder %s303_s14, 0 }
   0xf   : > { %p4243_p8 = por %p325_p5, %p324_p3  ;;  %p390_p9 = scmp.lt.s32.totalorder %s4123_s26, 3 }
  0x10   : > { %s4249_s16 = scalar_select %p306_p7, %s4111_s23, %s308_s30  }
  0x11   : > { %p391_p10 = pnand %p2998_p6, %p390_p9 }
  0x12   : > { %v3859_v0 = vld [vmem:[%s4991_s3] sm:$0xff] (!%p391_p10)   ;;  %v4125_v1 = vmov (!%p391_p10), 0.0   ;;  %v3860_v2 = vld [vmem:[%s4991_s3 + $0x8] sm:$0xff] (!%p391_p10)   ;;  %vm4126_vm0 = vmmov (!%p391_p10), 0   ;;  %v3861_v3 = vld [vmem:[%s4991_s3 + $0x10] sm:$0xff] (!%p391_p10)   ;;  %p437_p11 = scmp.lt.s32.totalorder (!%p391_p10), %s4115_s24, 1 }
  0x13   : > { %394 = sbr.rel (%p391_p10) target bundleno = 5213 (0x145d), region = 68  ;;  %3479 = vmatprep.subr.bf16.mxu0 (!%p391_p10), %v4125_v1  ;;  %3499 = vmatprep.subr.bf16.mxu1 (!%p391_p10), %v4125_v1  ;;  %v3862_v4 = vld [vmem:[%s4991_s3 + $0x18] sm:$0xff] (!%p391_p10)   ;;  %v3863_v5 = vld [vmem:[%s4991_s3 + $0x20] sm:$0xff] (!%p391_p10)   ;;  %v3864_v6 = vld [vmem:[%s4991_s3 + $0x28] sm:$0xff] (!%p391_p10)   ;;  %s5009_s0 = sld [smem:[#allocation9_spill]] (!%p391_p10)  ;;  %vm563_vm1 = vcmask (!%p391_p10), 261120  }
  0x14   : > { %3480 = vmatpush3.bf16.msra.mxu0 (!%p391_p10), %v3859_v0  ;;  %3495 = vmatprep.mubr.msk.bf16.mxu0 (!%p391_p10), %vm4126_vm0, %v4125_v1  ;;  %v3865_v7 = vld [vmem:[%s4991_s3 + $0x30] sm:$0xff] (!%p391_p10)   ;;  %v3866_v8 = vld [vmem:[%s4991_s3 + $0x38] sm:$0xff] (!%p391_p10)   ;;  %v3867_v12 = vld [vmem:[%s4991_s3 + $0x40] sm:$0xff] (!%p391_p10)   ;;  %s5010_s1 = sld [smem:[#allocation10_spill]] (!%p391_p10)  ;;  %vm1490_vm2 = vcmask (!%p391_p10), 130048  }
  0x15   : > { %3481 = vmatprep.subr.bf16.mxu0 (!%p391_p10), %v4125_v1  ;;  %3515 = vmatprep.mubr.msk.bf16.mxu1 (!%p391_p10), %vm4126_vm0, %v4125_v1  ;;  %v3890_v13 = vld [vmem:[%s4992_s4] sm:$0xff] (!%p391_p10)   ;;  %v3868_v14 = vld [vmem:[%s4991_s3 + $0x48] sm:$0xff] (!%p391_p10)   ;;  %v3869_v16 = vld [vmem:[%s4991_s3 + $0x50] sm:$0xff] (!%p391_p10)  }
  0x16   : > { %3500 = vmatpush3.bf16.msra.mxu1 (!%p391_p10), %v3890_v13  ;;  %v3892_v15 = vld [vmem:[%s4992_s4 + $0x8] sm:$0xff] (!%p391_p10)   ;;  %v3894_v17 = vld [vmem:[%s4992_s4 + $0x10] sm:$0xff] (!%p391_p10)   ;;  %v3870_v18 = vld [vmem:[%s4991_s3 + $0x58] sm:$0xff] (!%p391_p10)  }
  0x17   : > { %3501 = vmatprep.subr.bf16.mxu1 (!%p391_p10), %v4125_v1  ;;  %v3896_v19 = vld [vmem:[%s4992_s4 + $0x18] sm:$0xff] (!%p391_p10)   ;;  %v3871_v20 = vld [vmem:[%s4991_s3 + $0x60] sm:$0xff] (!%p391_p10)   ;;  %v3872_v22 = vld [vmem:[%s4991_s3 + $0x68] sm:$0xff] (!%p391_p10)  }
  0x18   : > { %3482 = vmatpush3.bf16.msra.mxu0 (!%p391_p10), %v3860_v2  ;;  %v3898_v21 = vld [vmem:[%s4992_s4 + $0x20] sm:$0xff] (!%p391_p10)   ;;  %v3900_v23 = vld [vmem:[%s4992_s4 + $0x28] sm:$0xff] (!%p391_p10)   ;;  %v3873_v24 = vld [vmem:[%s4991_s3 + $0x70] sm:$0xff] (!%p391_p10)  }
  0x19   : > { %3483 = vmatprep.subr.bf16.mxu0 (!%p391_p10), %v4125_v1  ;;  %v3902_v25 = vld [vmem:[%s4992_s4 + $0x30] sm:$0xff] (!%p391_p10)   ;;  %v3874_v26 = vld [vmem:[%s4991_s3 + $0x78] sm:$0xff] (!%p391_p10)   ;;  %v3875_v28 = vld [vmem:[%s4991_s3 + $0x80] sm:$0xff] (!%p391_p10)  }
  0x1a   : > { %s438_s19 = scalar_select %p437_p11, %s4115_s24, 1  ;;  %3502 = vmatpush3.bf16.msra.mxu1 %v3892_v15  ;;  %v3904_v27 = vld [vmem:[%s4992_s4 + $0x38] sm:$0xff]   ;;  %v3906_v29 = vld [vmem:[%s4992_s4 + $0x40] sm:$0xff]   ;;  %v3876_v30 = vld [vmem:[%s4991_s3 + $0x88] sm:$0xff]  }
  0x1b   : > { %3503 = vmatprep.subr.bf16.mxu1 %v4125_v1  ;;  %v3908_v31 = vld [vmem:[%s4992_s4 + $0x48] sm:$0xff]   ;;  %v3877_v32 = vld [vmem:[%s4991_s3 + $0x90] sm:$0xff]   ;;  %v3878_v34 = vld [vmem:[%s4991_s3 + $0x98] sm:$0xff]  }
  0x1c   : > { %3484 = vmatpush3.bf16.msra.mxu0 %v3861_v3  ;;  %s3315_s28 = sshll.u32 %s438_s19, 4  ;;  %v3909_v33 = vld [vmem:[%s4992_s4 + $0x50] sm:$0xff]   ;;  %v3910_v35 = vld [vmem:[%s4992_s4 + $0x58] sm:$0xff]   ;;  %v3879_v36 = vld [vmem:[%s4991_s3 + $0xa0] sm:$0xff]   ;;  %s3316_s19 = sshll.u32 %s4115_s24, 8 }
  0x1d   : > { %3485 = vmatprep.subr.bf16.mxu0 %v4125_v1  ;;  %s4288_s17 = scalar_lea.vmem %s5009_s0, %s3315_s28  ;;  %v3911_v37 = vld [vmem:[%s4992_s4 + $0x60] sm:$0xff]   ;;  %v3880_v38 = vld [vmem:[%s4991_s3 + $0xa8] sm:$0xff]   ;;  %v3881_v40 = vld [vmem:[%s4991_s3 + $0xb0] sm:$0xff]  }
  0x1e   : > { %v454_v9 = vld [vmem:[%s4288_s17] sm:$0xff]  ;;  %v455_v10 = vld [vmem:[%s4288_s17 + $0x8] sm:$0xff]  ;;  %3504 = vmatpush3.bf16.msra.mxu1 %v3894_v17  ;;  %v3913_v41 = vld [vmem:[%s4992_s4 + $0x70] sm:$0xff]  }
  0x1f   : > { %v4297_v11 = vpack.c.bf16 %v455_v10, %v454_v9  ;;  %3505 = vmatprep.subr.bf16.mxu1 %v4125_v1  ;;  %v3912_v39 = vld [vmem:[%s4992_s4 + $0x68] sm:$0xff]   ;;  %v3882_v42 = vld [vmem:[%s4991_s3 + $0xb8] sm:$0xff]   ;;  %v3883_v44 = vld [vmem:[%s4991_s3 + $0xc0] sm:$0xff]  }
  0x20   : > { %3486 = vmatpush3.bf16.msra.mxu0 %v3862_v4  ;;  %v3914_v43 = vld [vmem:[%s4992_s4 + $0x78] sm:$0xff]   ;;  %v3915_v45 = vld [vmem:[%s4992_s4 + $0x80] sm:$0xff]   ;;  %v3884_v46 = vld [vmem:[%s4991_s3 + $0xc8] sm:$0xff]  }
  0x21   : > { %3487 = vmatprep.subr.bf16.mxu0 %v4125_v1  ;;  %v3916_v47 = vld [vmem:[%s4992_s4 + $0x88] sm:$0xff]   ;;  %v3885_v48 = vld [vmem:[%s4991_s3 + $0xd0] sm:$0xff]   ;;  %v3886_v50 = vld [vmem:[%s4991_s3 + $0xd8] sm:$0xff]  }
  0x22   : > { %3506 = vmatpush3.bf16.msra.mxu1 %v3896_v19  ;;  %v3917_v49 = vld [vmem:[%s4992_s4 + $0x90] sm:$0xff]   ;;  %v3918_v51 = vld [vmem:[%s4992_s4 + $0x98] sm:$0xff]   ;;  %v3887_v52 = vld [vmem:[%s4991_s3 + $0xe0] sm:$0xff]  }
  0x23   : > { %3507 = vmatprep.subr.bf16.mxu1 %v4125_v1  ;;  %v3919_v53 = vld [vmem:[%s4992_s4 + $0xa0] sm:$0xff]   ;;  %v3888_v54 = vld [vmem:[%s4991_s3 + $0xe8] sm:$0xff]   ;;  %v3889_v56 = vld [vmem:[%s4991_s3 + $0xf0] sm:$0xff]  }
  0x24   : > { %3488 = vmatpush3.bf16.msra.mxu0 %v3863_v5  ;;  %v3920_v55 = vld [vmem:[%s4992_s4 + $0xa8] sm:$0xff]   ;;  %v3921_v57 = vld [vmem:[%s4992_s4 + $0xb0] sm:$0xff]   ;;  %v3891_v58 = vld [vmem:[%s4991_s3 + $0xf8] sm:$0xff]  }
  0x25   : > { %3489 = vmatprep.subr.bf16.mxu0 %v4125_v1  ;;  %v3922_v59 = vld [vmem:[%s4992_s4 + $0xb8] sm:$0xff]   ;;  %v3893_v60 = vld [vmem:[%s4990_s2] sm:$0xff]   ;;  %v3895_v62 = vld [vmem:[%s4990_s2 + $0x8] sm:$0xff]  }
  0x26   : > { %3508 = vmatpush3.bf16.msra.mxu1 %v3898_v21  ;;  %v3923_v61 = vld [vmem:[%s4992_s4 + $0xc0] sm:$0xff]   ;;  %v3924_v63 = vld [vmem:[%s4992_s4 + $0xc8] sm:$0xff]   ;;  %v3897_v0 = vld [vmem:[%s4990_s2 + $0x10] sm:$0xff]  }
  0x27   : > { %3509 = vmatprep.subr.bf16.mxu1 %v4125_v1  ;;  %v3925_v2 = vld [vmem:[%s4992_s4 + $0xd0] sm:$0xff]   ;;  %v3899_v3 = vld [vmem:[%s4990_s2 + $0x18] sm:$0xff]   ;;  %v3901_v5 = vld [vmem:[%s4990_s2 + $0x20] sm:$0xff]  }
  0x28   : > { %3490 = vmatpush3.bf16.msra.mxu0 %v3864_v6  ;;  %v3926_v4 = vld [vmem:[%s4992_s4 + $0xd8] sm:$0xff]   ;;  %v3927_v6 = vld [vmem:[%s4992_s4 + $0xe0] sm:$0xff]   ;;  %v3905_v9 = vld [vmem:[%s4990_s2 + $0x30] sm:$0xff]  }
  0x29   : > { %3491 = vmatprep.subr.bf16.mxu0 %v4125_v1  ;;  %v3929_v10 = vld [vmem:[%s4992_s4 + $0xf0] sm:$0xff]   ;;  %v3930_v13 = vld [vmem:[%s4992_s4 + $0xf8] sm:$0xff]  }
  0x2a   : > { %3510 = vmatpush3.bf16.msra.mxu1 %v3900_v23 }
  0x2b   : > { %3511 = vmatprep.subr.bf16.mxu1 %v4125_v1 }
  0x2c   : > { %3492 = vmatpush3.bf16.msra.mxu0 %v3865_v7  ;;  %v3903_v7 = vld [vmem:[%s4990_s2 + $0x28] sm:$0xff]  }
  0x2d   : > { %3493 = vmatprep.subr.bf16.mxu0 %v4125_v1 }
  0x2e   : > { %3512 = vmatpush3.bf16.msra.mxu1 %v3902_v25 }
  0x2f   : > { %3513 = vmatprep.subr.bf16.mxu1 %v4125_v1 }
  0x30   : > { %3494 = vmatpush3.bf16.msra.mxu0 %v3866_v8  ;;  %v3928_v8 = vld [vmem:[%s4992_s4 + $0xe8] sm:$0xff]  }
  0x31   : > { %3519 = vmatprep.subr.bf16.mxu0 %v4125_v1 }
  0x32   : > { %3514 = vmatpush3.bf16.msra.mxu1 %v3904_v27 }
  0x33   : > { %3496 = vmatmul.mubr.bf16.vlgmr.msra.gmra.mrb[0].mxu0 %v4297_v11  ;;  %3539 = vmatprep.subr.bf16.mxu1 %v4125_v1 }
  0x34   : > { %3520 = vmatpush3.bf16.msra.mxu0 %v3867_v12  ;;  %3535 = vmatprep.mubr.msk.bf16.mxu0 %vm4126_vm0, %v4125_v1  ;;  %v3907_v12 = vld [vmem:[%s4990_s2 + $0x38] sm:$0xff]  }
  0x35   : > { %3521 = vmatprep.subr.bf16.mxu0 %v4125_v1  ;;  %3516 = vmatmul.mubr.bf16.vlgmr.msra.gmra.mrb[0].mxu1 %v4297_v11 }
  0x36   : > { %3540 = vmatpush3.bf16.msra.mxu1 %v3906_v29  ;;  %3555 = vmatprep.mubr.msk.bf16.mxu1 %vm4126_vm0, %v4125_v1 }
  0x37   : > { %3541 = vmatprep.subr.bf16.mxu1 %v4125_v1 }
  0x38   : > { %3522 = vmatpush3.bf16.msra.mxu0 %v3868_v14 }
  0x39   : > { %3523 = vmatprep.subr.bf16.mxu0 %v4125_v1 }
  0x3a   : > { %3542 = vmatpush3.bf16.msra.mxu1 %v3908_v31 }
  0x3b   : > { %3543 = vmatprep.subr.bf16.mxu1 %v4125_v1 }
  0x3c   : > { %3524 = vmatpush3.bf16.msra.mxu0 %v3869_v16 }
  0x3d   : > { %3525 = vmatprep.subr.bf16.mxu0 %v4125_v1 }
  0x3e   : > { %3544 = vmatpush3.bf16.msra.mxu1 %v3909_v33 }
  0x3f   : > { %3545 = vmatprep.subr.bf16.mxu1 %v4125_v1 }
  0x40   : > { %3526 = vmatpush3.bf16.msra.mxu0 %v3870_v18 }
  0x41   : > { %3527 = vmatprep.subr.bf16.mxu0 %v4125_v1 }
  0x42   : > { %3546 = vmatpush3.bf16.msra.mxu1 %v3910_v35 }
  0x43   : > { %3547 = vmatprep.subr.bf16.mxu1 %v4125_v1 }
  0x44   : > { %3528 = vmatpush3.bf16.msra.mxu0 %v3871_v20 }
  0x45   : > { %3529 = vmatprep.subr.bf16.mxu0 %v4125_v1 }
  0x46   : > { %3548 = vmatpush3.bf16.msra.mxu1 %v3911_v37 }
  0x47   : > { %3549 = vmatprep.subr.bf16.mxu1 %v4125_v1 }
  0x48   : > { %3530 = vmatpush3.bf16.msra.mxu0 %v3872_v22 }
  0x49   : > { %3531 = vmatprep.subr.bf16.mxu0 %v4125_v1 }
  0x4a   : > { %3550 = vmatpush3.bf16.msra.mxu1 %v3912_v39 }
  0x4b   : > { %3551 = vmatprep.subr.bf16.mxu1 %v4125_v1 }
  0x4c   : > { %3532 = vmatpush3.bf16.msra.mxu0 %v3873_v24 }
  0x4d   : > { %3533 = vmatprep.subr.bf16.mxu0 %v4125_v1 }
  0x4e   : > { %3552 = vmatpush3.bf16.msra.mxu1 %v3913_v41 }
  0x4f   : > { %3553 = vmatprep.subr.bf16.mxu1 %v4125_v1 }
  0x50   : > { %3534 = vmatpush3.bf16.msra.mxu0 %v3874_v26 }
  0x51   : > { %3559 = vmatprep.subr.bf16.mxu0 %v4125_v1 }
  0x52   : > { %3554 = vmatpush3.bf16.msra.mxu1 %v3914_v43 }
  0x53   : > { %3536 = vmatmul.mubr.bf16.vlgmr.msra.gmra.mrb[4].mxu0 %v4297_v11  ;;  %3579 = vmatprep.subr.bf16.mxu1 %v4125_v1 }
  0x54   : > { %3560 = vmatpush3.bf16.msra.mxu0 %v3875_v28  ;;  %3575 = vmatprep.mubr.msk.bf16.mxu0 %vm4126_vm0, %v4125_v1 }
  0x55   : > { %3561 = vmatprep.subr.bf16.mxu0 %v4125_v1  ;;  %3556 = vmatmul.mubr.bf16.vlgmr.msra.gmra.mrb[4].mxu1 %v4297_v11 }
  0x56   : > { %3580 = vmatpush3.bf16.msra.mxu1 %v3915_v45  ;;  %3595 = vmatprep.mubr.msk.bf16.mxu1 %vm4126_vm0, %v4125_v1 }
  0x57   : > { %3581 = vmatprep.subr.bf16.mxu1 %v4125_v1 }
  0x58   : > { %3562 = vmatpush3.bf16.msra.mxu0 %v3876_v30 }
  0x59   : > { %3563 = vmatprep.subr.bf16.mxu0 %v4125_v1 }
  0x5a   : > { %3582 = vmatpush3.bf16.msra.mxu1 %v3916_v47 }
  0x5b   : > { %3583 = vmatprep.subr.bf16.mxu1 %v4125_v1 }
  0x5c   : > { %3564 = vmatpush3.bf16.msra.mxu0 %v3877_v32 }
  0x5d   : > { %3565 = vmatprep.subr.bf16.mxu0 %v4125_v1 }
  0x5e   : > { %3584 = vmatpush3.bf16.msra.mxu1 %v3917_v49 }
  0x5f   : > { %3585 = vmatprep.subr.bf16.mxu1 %v4125_v1 }
  0x60   : > { %3566 = vmatpush3.bf16.msra.mxu0 %v3878_v34 }
  0x61   : > { %3567 = vmatprep.subr.bf16.mxu0 %v4125_v1 }
  0x62   : > { %3586 = vmatpush3.bf16.msra.mxu1 %v3918_v51 }
  0x63   : > { %3587 = vmatprep.subr.bf16.mxu1 %v4125_v1 }
  0x64   : > { %3568 = vmatpush3.bf16.msra.mxu0 %v3879_v36 }
  0x65   : > { %3569 = vmatprep.subr.bf16.mxu0 %v4125_v1 }
  0x66   : > { %3588 = vmatpush3.bf16.msra.mxu1 %v3919_v53 }
  0x67   : > { %3589 = vmatprep.subr.bf16.mxu1 %v4125_v1 }
  0x68   : > { %3570 = vmatpush3.bf16.msra.mxu0 %v3880_v38 }
  0x69   : > { %3571 = vmatprep.subr.bf16.mxu0 %v4125_v1 }
  0x6a   : > { %3590 = vmatpush3.bf16.msra.mxu1 %v3920_v55 }
  0x6b   : > { %3591 = vmatprep.subr.bf16.mxu1 %v4125_v1 }
  0x6c   : > { %3572 = vmatpush3.bf16.msra.mxu0 %v3881_v40 }
  0x6d   : > { %3573 = vmatprep.subr.bf16.mxu0 %v4125_v1 }
  0x6e   : > { %3592 = vmatpush3.bf16.msra.mxu1 %v3921_v57 }
  0x6f   : > { %3593 = vmatprep.subr.bf16.mxu1 %v4125_v1 }
  0x70   : > { %3574 = vmatpush3.bf16.msra.mxu0 %v3882_v42 }
  0x71   : > { %3599 = vmatprep.subr.bf16.mxu0 %v4125_v1 }
  0x72   : > { %3594 = vmatpush3.bf16.msra.mxu1 %v3922_v59 }
  0x73   : > { %3576 = vmatmul.mubr.bf16.vlgmr.msra.gmra.mrb[8].mxu0 %v4297_v11  ;;  %3619 = vmatprep.subr.bf16.mxu1 %v4125_v1 }
  0x74   : > { %3600 = vmatpush3.bf16.msra.mxu0 %v3883_v44  ;;  %3615 = vmatprep.mubr.msk.bf16.mxu0 %vm4126_vm0, %v4125_v1 }
  0x75   : > { %3601 = vmatprep.subr.bf16.mxu0 %v4125_v1  ;;  %3596 = vmatmul.mubr.bf16.vlgmr.msra.gmra.mrb[8].mxu1 %v4297_v11 }
  0x76   : > { %3620 = vmatpush3.bf16.msra.mxu1 %v3923_v61  ;;  %3635 = vmatprep.mubr.msk.bf16.mxu1 %vm4126_vm0, %v4125_v1 }
  0x77   : > { %3621 = vmatprep.subr.bf16.mxu1 %v4125_v1 }
  0x78   : > { %3602 = vmatpush3.bf16.msra.mxu0 %v3884_v46 }
  0x79   : > { %3603 = vmatprep.subr.bf16.mxu0 %v4125_v1 }
  0x7a   : > { %3622 = vmatpush3.bf16.msra.mxu1 %v3924_v63 }
  0x7b   : > { %3623 = vmatprep.subr.bf16.mxu1 %v4125_v1 }
  0x7c   : > { %3604 = vmatpush3.bf16.msra.mxu0 %v3885_v48 }
  0x7d   : > { %3605 = vmatprep.subr.bf16.mxu0 %v4125_v1 }
  0x7e   : > { %3624 = vmatpush3.bf16.msra.mxu1 %v3925_v2 }
  0x7f   : > { %3625 = vmatprep.subr.bf16.mxu1 %v4125_v1 }
  0x80   : > { %3606 = vmatpush3.bf16.msra.mxu0 %v3886_v50 }
  0x81   : > { %3607 = vmatprep.subr.bf16.mxu0 %v4125_v1 }
  0x82   : > { %3626 = vmatpush3.bf16.msra.mxu1 %v3926_v4 }
  0x83   : > { %3627 = vmatprep.subr.bf16.mxu1 %v4125_v1 }
  0x84   : > { %3608 = vmatpush3.bf16.msra.mxu0 %v3887_v52 }
  0x85   : > { %3609 = vmatprep.subr.bf16.mxu0 %v4125_v1 }
  0x86   : > { %3628 = vmatpush3.bf16.msra.mxu1 %v3927_v6 }
  0x87   : > { %3629 = vmatprep.subr.bf16.mxu1 %v4125_v1 }
  0x88   : > { %3610 = vmatpush3.bf16.msra.mxu0 %v3888_v54 }
  0x89   : > { %3611 = vmatprep.subr.bf16.mxu0 %v4125_v1 }
  0x8a   : > { %3630 = vmatpush3.bf16.msra.mxu1 %v3928_v8 }
  0x8b   : > { %3631 = vmatprep.subr.bf16.mxu1 %v4125_v1 }
  0x8c   : > { %3612 = vmatpush3.bf16.msra.mxu0 %v3889_v56 }
  0x8d   : > { %3613 = vmatprep.subr.bf16.mxu0 %v4125_v1 }
  0x8e   : > { %3632 = vmatpush3.bf16.msra.mxu1 %v3929_v10 }
  0x8f   : > { %3633 = vmatprep.subr.bf16.mxu1 %v4125_v1 }
  0x90   : > { %3614 = vmatpush3.bf16.msra.mxu0 %v3891_v58 }
  0x91   : > { %3639 = vmatprep.subr.bf16.mxu0 %v4125_v1 }
  0x92   : > { %3634 = vmatpush3.bf16.msra.mxu1 %v3930_v13 }
  0x93   : > { %3616 = vmatmul.mubr.bf16.vlgmr.msra.gmra.mrb[12].mxu0 %v4297_v11  ;;  %3659 = vmatprep.subr.bf16.mxu1 %v4125_v1 }
  0x94   : > { %3640 = vmatpush3.bf16.msra.mxu0 %v3893_v60  ;;  %3655 = vmatprep.mubr.msk.bf16.mxu0 %vm4126_vm0, %v4125_v1 }
  0x95   : > { %3641 = vmatprep.subr.bf16.mxu0 %v4125_v1  ;;  %3636 = vmatmul.mubr.bf16.vlgmr.msra.gmra.mrb[12].mxu1 %v4297_v11 }
  0x96   : > { %3661 = vmatprep.mubr.msk.bf16.mxu1 %vm4126_vm0, %v4125_v1 }
  0x98   : > { %3642 = vmatpush3.bf16.msra.mxu0 %v3895_v62 }
  0x99   : > { %3643 = vmatprep.subr.bf16.mxu0 %v4125_v1 }
  0x9c   : > { %3644 = vmatpush3.bf16.msra.mxu0 %v3897_v0  ;;  %v3318_v0 = vld [vmem:[%s5010_s1] sm:$0xff]   ;;  %s4938_s1 = scalar_lea.hbm %s5000_s12, %s3316_s19 }
  0x9d   : > { %3645 = vmatprep.subr.bf16.mxu0 %v4125_v1  ;;  %v4602_v2 = vunpack.c.l.bf16 %v3318_v0 }
  0xa0   : > { %3646 = vmatpush3.bf16.msra.mxu0 %v3899_v3  ;;  %v4604_v3 = vunpack.c.h.bf16 %v3318_v0 }
  0xa1   : > { %3647 = vmatprep.subr.bf16.mxu0 %v4125_v1 }
  0xa4   : > { %3648 = vmatpush3.bf16.msra.mxu0 %v3901_v5 }
  0xa5   : > { %3649 = vmatprep.subr.bf16.mxu0 %v4125_v1 }
  0xa8   : > { %3650 = vmatpush3.bf16.msra.mxu0 %v3903_v7 }
  0xa9   : > { %3651 = vmatprep.subr.bf16.mxu0 %v4125_v1 }
  0xac   : > { %3652 = vmatpush3.bf16.msra.mxu0 %v3905_v9 }
  0xad   : > { %3653 = vmatprep.subr.bf16.mxu0 %v4125_v1 }
  0xb0   : > { %3654 = vmatpush3.bf16.msra.mxu0 %v3907_v12 }
  0xb1   : > { %3691 = vmatprep.subr.bf16.mxu0 %v4125_v1 }
  0xb3   : > { %3656 = vmatmul.mubr.bf16.vlgmr.msra.gmra.mrb[16].mxu0 %v4297_v11 }
  0xb4   : > { %3693 = vmatprep.mubr.msk.bf16.mxu0 %vm4126_vm0, %v4125_v1 }
 0x106   : > { %v555_v14 = vpop.f32.mrb[0].mxu0 }
 0x107   : > { %v3497_v15 = vpop.f32.mrb[1].mxu0 }
 0x108   : > { %v558_v16 = vpop.f32.mrb[2].mxu0  ;;  %v663_v24 = vpop.f32.mrb[0].mxu1 }
 0x109   : > { %v562_v17 = vpack.c.bf16 %v558_v16, %v555_v14  ;;  %v3498_v18 = vpop.f32.mrb[3].mxu0  ;;  %v3517_v27 = vpop.f32.mrb[1].mxu1 }
 0x10a   : > { %v666_v28 = vpop.f32.mrb[2].mxu1 }
 0x10b   : > { %564 = vst.msk [vmem:[#allocation2] sm:$0xff] %vm563_vm1, %v562_v17  ;;  %v670_v29 = vpack.c.bf16 %v666_v28, %v663_v24  ;;  %v3518_v30 = vpop.f32.mrb[3].mxu1 }
 0x10d   : > { %671 = vst.msk [vmem:[#allocation3] sm:$0xff] %vm563_vm1, %v670_v29  ;;  %v3931_v29 = vld [vmem:[%s4990_s2 + $0x40] sm:$0xff]  }
 0x112   : > { %v1441_v19 = vld [vmem:[#allocation2] sm:$0xff] }
 0x113   : > { %v1447_v20 = vsel %vm563_vm1, %v1441_v19, 0 }
 0x114   : > { %3660 = vmatpush3.bf16.xpose.msra.mxu1 %v1447_v20  ;;  %v1514_v59 = vld [vmem:[#allocation3] sm:$0xff] }
 0x115   : > { %3665 = vmatprep.subr.bf16.mxu1 %v4125_v1 }
 0x126   : > { %v771_v21 = vpop.f32.mrb[4].mxu0 }
 0x127   : > { %v3537_v22 = vpop.f32.mrb[5].mxu0 }
 0x128   : > { %v774_v23 = vpop.f32.mrb[6].mxu0  ;;  %v880_v36 = vpop.f32.mrb[4].mxu1 }
 0x129   : > { %v778_v25 = vpack.c.bf16 %v774_v23, %v771_v21  ;;  %v3538_v26 = vpop.f32.mrb[7].mxu0  ;;  %v3557_v39 = vpop.f32.mrb[5].mxu1 }
 0x12a   : > { %v883_v40 = vpop.f32.mrb[6].mxu1  ;;  %v3940_v39 = vld [vmem:[%s4993_s5 + $0x8] sm:$0xff]  }
 0x12b   : > { %780 = vst.msk [vmem:[#allocation2 + $0x8] sm:$0xff] %vm563_vm1, %v778_v25  ;;  %v887_v41 = vpack.c.bf16 %v883_v40, %v880_v36  ;;  %v3558_v42 = vpop.f32.mrb[7].mxu1  ;;  %v3937_v36 = vld [vmem:[%s4990_s2 + $0x70] sm:$0xff]  }
 0x12d   : > { %889 = vst.msk [vmem:[#allocation3 + $0x8] sm:$0xff] %vm563_vm1, %v887_v41 }
 0x132   : > { %v1672_v31 = vld [vmem:[#allocation2 + $0x8] sm:$0xff] }
 0x133   : > { %v1677_v32 = vsel %vm563_vm1, %v1672_v31, 0  ;;  %v3932_v31 = vld [vmem:[%s4990_s2 + $0x48] sm:$0xff]  }
 0x134   : > { %3692 = vmatpush3.bf16.xpose.msra.mxu0 %v1677_v32  ;;  %v3933_v32 = vld [vmem:[%s4990_s2 + $0x50] sm:$0xff]  }
 0x135   : > { %3697 = vmatprep.subr.bf16.mxu0 %v4125_v1 }
 0x146   : > { %v989_v33 = vpop.f32.mrb[8].mxu0 }
 0x147   : > { %v3577_v34 = vpop.f32.mrb[9].mxu0 }
 0x148   : > { %v992_v35 = vpop.f32.mrb[10].mxu0  ;;  %v1098_v46 = vpop.f32.mrb[8].mxu1  ;;  %v3935_v34 = vld [vmem:[%s4990_s2 + $0x60] sm:$0xff]  }
 0x149   : > { %v996_v37 = vpack.c.bf16 %v992_v35, %v989_v33  ;;  %v3578_v38 = vpop.f32.mrb[11].mxu0  ;;  %v3597_v49 = vpop.f32.mrb[9].mxu1  ;;  %v3934_v33 = vld [vmem:[%s4990_s2 + $0x58] sm:$0xff]   ;;  %v3936_v35 = vld [vmem:[%s4990_s2 + $0x68] sm:$0xff]  }
 0x14a   : > { %v1101_v50 = vpop.f32.mrb[10].mxu1  ;;  %v3939_v38 = vld [vmem:[%s4993_s5] sm:$0xff]  }
 0x14b   : > { %998 = vst.msk [vmem:[#allocation2 + $0x10] sm:$0xff] %vm563_vm1, %v996_v37  ;;  %v1105_v51 = vpack.c.bf16 %v1101_v50, %v1098_v46  ;;  %v3598_v52 = vpop.f32.mrb[11].mxu1  ;;  %v3938_v37 = vld [vmem:[%s4990_s2 + $0x78] sm:$0xff]  }
 0x14c   : > { %v1744_v52 = vld [vmem:[#allocation3 + $0x8] sm:$0xff] }
 0x14d   : > { %1107 = vst.msk [vmem:[#allocation3 + $0x10] sm:$0xff] %vm563_vm1, %v1105_v51 }
 0x166   : > { %v1207_v43 = vpop.f32.mrb[12].mxu0 }
 0x167   : > { %v3617_v44 = vpop.f32.mrb[13].mxu0 }
 0x168   : > { %v1210_v45 = vpop.f32.mrb[14].mxu0  ;;  %v1316_v56 = vpop.f32.mrb[12].mxu1 }
 0x169   : > { %v1214_v47 = vpack.c.bf16 %v1210_v45, %v1207_v43  ;;  %v3618_v48 = vpop.f32.mrb[15].mxu0  ;;  %v3637_v60 = vpop.f32.mrb[13].mxu1  ;;  %v2015_v43 = vld [vmem:[#allocation2 + $0x10] sm:$0xff] }
 0x16a   : > { %v1319_v61 = vpop.f32.mrb[14].mxu1  ;;  %v2020_v46 = vsel %vm563_vm1, %v2015_v43, 0 }
 0x16b   : > { %1216 = vst.msk [vmem:[#allocation2 + $0x18] sm:$0xff] %vm563_vm1, %v1214_v47  ;;  %v1323_v62 = vpack.c.bf16 %v1319_v61, %v1316_v56  ;;  %v3638_v63 = vpop.f32.mrb[15].mxu1 }
 0x16d   : > { %1325 = vst.msk [vmem:[#allocation3 + $0x18] sm:$0xff] %vm563_vm1, %v1323_v62 }
 0x186   : > { %v1433_v53 = vpop.f32.mrb[16].mxu0 }
 0x187   : > { %v3657_v54 = vpop.f32.mrb[17].mxu0 }
 0x188   : > { %v1436_v55 = vpop.f32.mrb[18].mxu0 }
 0x189   : > { %v1440_v57 = vpack.c.bf16 %v1436_v55, %v1433_v53  ;;  %v3658_v58 = vpop.f32.mrb[19].mxu0 }
 0x18b   : > { %3662 = vmatmul.mubr.msk.bf16.vlgmr.msra.gmra.mrb[16].mxu1 %vm563_vm1, %v1440_v57 }
 0x18c   : > { %3666 = vmatpush3.bf16.msra.mxu1 %v1514_v59  ;;  %3667 = vmatprep.mubr.msk.bf16.mxu1 %vm4126_vm0, %v4125_v1 }
 0x18d   : > { %3671 = vmatprep.subr.bf16.mxu1 %v4125_v1 }
 0x25e   : > { %v1483_v4 = vpop.f32.mrb[16].mxu1 }
 0x25f   : > { %v1484_v5 = vadd.f32 %v4602_v2, %v1483_v4  ;;  %v3663_v6 = vpop.f32.mrb[17].mxu1 }
 0x260   : > { %v1486_v7 = vpop.f32.mrb[18].mxu1 }
 0x261   : > { %v1487_v8 = vadd.f32 %v4604_v3, %v1486_v7  ;;  %v3664_v9 = vpop.f32.mrb[19].mxu1  ;;  %v1491_v10 = vsel %vm1490_vm2, %v1484_v5, -inf }
 0x262   : > { %1492 = vmax.xlane.f32.xlu0 %v1491_v10 }
 0x263   : > { %v1494_v12 = vsel %vm1490_vm2, %v1487_v8, -inf }
 0x266   : > { %1495 = vmax.xlane.f32.xlu0 %v1494_v12 }
 0x2ef   : > { %v1493_v13 = vpop.xlane.xlu0 %1492 }
 0x2f0   : > { %v1497_v14 = vsub.f32 %v1484_v5, %v1493_v13 }
 0x2f2   : > { %v1499_v15 = vmul.f32 1.442695, %v1497_v14 }
 0x2f3   : > { %v1496_v16 = vpop.xlane.xlu0 %1495 }
 0x2f4   : > { %4003 = vpow2.f32 %v1499_v15  ;;  %v1498_v17 = vsub.f32 %v1487_v8, %v1496_v16 }
 0x2f6   : > { %v1501_v18 = vmul.f32 1.442695, %v1498_v17 }
 0x2f8   : > { %4005 = vpow2.f32 %v1501_v18 }
 0x2fe   : > { %v4004_v19 = vpop.eup %4003 }
 0x2ff   : > { %v1503_v20 = vsel %vm1490_vm2, %v4004_v19, 0.0 }
 0x300   : > { %1504 = vadd.xlane.f32.xlu1 %v1503_v20 }
 0x302   : > { %v4006_v21 = vpop.eup %4005 }
 0x303   : > { %v1506_v22 = vsel %vm1490_vm2, %v4006_v21, 0.0 }
 0x304   : > { %1507 = vadd.xlane.f32.xlu1 %v1506_v22 }
 0x38d   : > { %v1505_v23 = vpop.xlane.xlu1 %1504 }
 0x38e   : > { %4007 = vrcp.f32 %v1505_v23  ;;  %v3942_v23 = vld [vmem:[%s4993_s5 + $0x18] sm:$0xff]  }
 0x391   : > { %v1508_v24 = vpop.xlane.xlu1 %1507 }
 0x392   : > { %4009 = vrcp.f32 %v1508_v24 }
 0x398   : > { %v4008_v25 = vpop.eup %4007 }
 0x399   : > { %v1511_v27 = vmul.f32 %v4008_v25, %v4004_v19 }
 0x39c   : > { %v4010_v26 = vpop.eup %4009 }
 0x39d   : > { %v1512_v28 = vmul.f32 %v4010_v26, %v4006_v21  ;;  %v3941_v21 = vld [vmem:[%s4993_s5 + $0x10] sm:$0xff]  }
 0x39f   : > { %v1513_v30 = vpack.c.bf16 %v1512_v28, %v1511_v27  ;;  %v3943_v27 = vld [vmem:[%s4990_s2 + $0x80] sm:$0xff]  }
 0x3a1   : > { %3668 = vmatmul.mubr.msk.bf16.vlgmr.msra.gmra.mrb[20].mxu1 %vm1490_vm2, %v1513_v30  ;;  %v3944_v30 = vld [vmem:[%s4990_s2 + $0x88] sm:$0xff]  }
 0x3a2   : > { %3672 = vmatpush3.bf16.msra.mxu1 %v3931_v29  ;;  %3687 = vmatprep.mubr.msk.bf16.mxu1 %vm4126_vm0, %v4125_v1 }
 0x3a3   : > { %3673 = vmatprep.subr.bf16.mxu1 %v4125_v1 }
 0x3a6   : > { %3674 = vmatpush3.bf16.msra.mxu1 %v3932_v31  ;;  %v3945_v31 = vld [vmem:[%s4990_s2 + $0x90] sm:$0xff]  }
 0x3a7   : > { %3675 = vmatprep.subr.bf16.mxu1 %v4125_v1 }
 0x3aa   : > { %3676 = vmatpush3.bf16.msra.mxu1 %v3933_v32  ;;  %v3946_v32 = vld [vmem:[%s4990_s2 + $0x98] sm:$0xff]  }
 0x3ab   : > { %3677 = vmatprep.subr.bf16.mxu1 %v4125_v1 }
 0x3ae   : > { %3678 = vmatpush3.bf16.msra.mxu1 %v3934_v33  ;;  %v3947_v33 = vld [vmem:[%s4990_s2 + $0xa0] sm:$0xff]  }
 0x3af   : > { %3679 = vmatprep.subr.bf16.mxu1 %v4125_v1 }
 0x3b2   : > { %3680 = vmatpush3.bf16.msra.mxu1 %v3935_v34  ;;  %v3948_v34 = vld [vmem:[%s4990_s2 + $0xa8] sm:$0xff]  }
 0x3b3   : > { %3681 = vmatprep.subr.bf16.mxu1 %v4125_v1 }
 0x3b6   : > { %3682 = vmatpush3.bf16.msra.mxu1 %v3936_v35  ;;  %v3949_v35 = vld [vmem:[%s4990_s2 + $0xb0] sm:$0xff]  }
 0x3b7   : > { %3683 = vmatprep.subr.bf16.mxu1 %v4125_v1 }
 0x3ba   : > { %3684 = vmatpush3.bf16.msra.mxu1 %v3937_v36  ;;  %v3950_v36 = vld [vmem:[%s4990_s2 + $0xb8] sm:$0xff]  }
 0x3bb   : > { %3685 = vmatprep.subr.bf16.mxu1 %v4125_v1 }
 0x3be   : > { %3686 = vmatpush3.bf16.msra.mxu1 %v3938_v37  ;;  %v2304_v37 = vld [vmem:[#allocation2 + $0x18] sm:$0xff] }
 0x3bf   : > { %3711 = vmatprep.subr.bf16.mxu1 %v4125_v1 }
 0x3c1   : > { %3688 = vmatmul.mubr.bf16.vlgmr.msra.gmra.mrb[24].mxu1 %v4297_v11 }
 0x3c2   : > { %3712 = vmatpush3.bf16.msra.mxu1 %v3939_v38  ;;  %3715 = vmatprep.mubr.msk.bf16.mxu1 %vm4126_vm0, %v4125_v1  ;;  %v2309_v38 = vsel %vm563_vm1, %v2304_v37, 0 }
 0x3c3   : > { %3713 = vmatprep.subr.bf16.mxu1 %v4125_v1 }
 0x3c6   : > { %3714 = vmatpush3.bf16.msra.mxu1 %v3940_v39 }
 0x3c7   : > { %3739 = vmatprep.subr.bf16.mxu1 %v4125_v1 }
 0x474   : > { %v1552_v40 = vpop.f32.mrb[20].mxu1 }
 0x475   : > { %v3669_v41 = vpop.f32.mrb[21].mxu1 }
 0x476   : > { %v1555_v42 = vpop.f32.mrb[22].mxu1 }
 0x477   : > { %v1559_v44 = vpack.c.bf16 %v1555_v42, %v1552_v40  ;;  %v3670_v45 = vpop.f32.mrb[23].mxu1 }
 0x479   : > { %3716 = vmatmul.mubr.msk.bf16.vlgmr.msra.gmra.mrb[28].mxu1 %vm563_vm1, %v1559_v44 }
 0x47a   : > { %3740 = vmatpush3.bf16.xpose.msra.mxu1 %v2020_v46  ;;  %3741 = vmatprep.mubr.msk.bf16.mxu1 %vm4126_vm0, %v4125_v1 }
 0x47b   : > { %3745 = vmatprep.subr.bf16.mxu1 %v4125_v1 }
 0x494   : > { %v1663_v47 = vpop.f32.mrb[24].mxu1 }
 0x495   : > { %v3689_v48 = vpop.f32.mrb[25].mxu1 }
 0x496   : > { %v1666_v49 = vpop.f32.mrb[26].mxu1 }
 0x497   : > { %v1670_v50 = vpack.c.bf16 %v1666_v49, %v1663_v47  ;;  %v3690_v51 = vpop.f32.mrb[27].mxu1 }
 0x499   : > { %3694 = vmatmul.mubr.msk.bf16.vlgmr.msra.gmra.mrb[20].mxu0 %vm563_vm1, %v1670_v50  ;;  %v2087_v50 = vld [vmem:[#allocation3 + $0x10] sm:$0xff] }
 0x49a   : > { %3698 = vmatpush3.bf16.msra.mxu0 %v1744_v52  ;;  %3699 = vmatprep.mubr.msk.bf16.mxu0 %vm4126_vm0, %v4125_v1 }
 0x49b   : > { %3703 = vmatprep.subr.bf16.mxu0 %v4125_v1 }
 0x54c   : > { %v4667_v53 = vpop.f32.mrb[28].mxu1 }
 0x54d   : > { %v3717_v54 = vpop.f32.mrb[29].mxu1 }
 0x54e   : > { %v4669_v55 = vpop.f32.mrb[30].mxu1 }
 0x54f   : > { %v3718_v56 = vpop.f32.mrb[31].mxu1 }
 0x56c   : > { %v1713_v57 = vpop.f32.mrb[20].mxu0 }
 0x56d   : > { %v1714_v58 = vadd.f32 %v4602_v2, %v1713_v57  ;;  %v3695_v59 = vpop.f32.mrb[21].mxu0 }
 0x56e   : > { %v1716_v60 = vpop.f32.mrb[22].mxu0 }
 0x56f   : > { %v1717_v61 = vadd.f32 %v4604_v3, %v1716_v60  ;;  %v3696_v62 = vpop.f32.mrb[23].mxu0  ;;  %v1720_v63 = vsel %vm1490_vm2, %v1714_v58, -inf }
 0x570   : > { %1721 = vmax.xlane.f32.xlu0 %v1720_v63 }
 0x571   : > { %v1723_v0 = vsel %vm1490_vm2, %v1717_v61, -inf }
 0x572   : > { %1724 = vmax.xlane.f32.xlu1 %v1723_v0 }
 0x5fd   : > { %v1722_v4 = vpop.xlane.xlu0 %1721 }
 0x5fe   : > { %v1726_v5 = vsub.f32 %v1714_v58, %v1722_v4 }
 0x5ff   : > { %v1725_v6 = vpop.xlane.xlu1 %1724 }
 0x600   : > { %v1728_v7 = vmul.f32 1.442695, %v1726_v5  ;;  %v1727_v8 = vsub.f32 %v1717_v61, %v1725_v6 }
 0x602   : > { %4011 = vpow2.f32 %v1728_v7  ;;  %v1730_v9 = vmul.f32 1.442695, %v1727_v8 }
 0x604   : > { %4013 = vpow2.f32 %v1730_v9 }
 0x60c   : > { %v4012_v10 = vpop.eup %4011 }
 0x60d   : > { %v1732_v12 = vsel %vm1490_vm2, %v4012_v10, 0.0 }
 0x60e   : > { %v4014_v13 = vpop.eup %4013  ;;  %1733 = vadd.xlane.f32.xlu0 %v1732_v12 }
 0x60f   : > { %v1735_v14 = vsel %vm1490_vm2, %v4014_v13, 0.0 }
 0x610   : > { %1736 = vadd.xlane.f32.xlu1 %v1735_v14 }
 0x69b   : > { %v1734_v15 = vpop.xlane.xlu0 %1733 }
 0x69c   : > { %4015 = vrcp.f32 %v1734_v15  ;;  %v3951_v15 = vld [vmem:[%s4993_s5 + $0x20] sm:$0xff]  }
 0x69d   : > { %v1737_v16 = vpop.xlane.xlu1 %1736 }
 0x69e   : > { %4017 = vrcp.f32 %v1737_v16 }
 0x6a6   : > { %v4016_v17 = vpop.eup %4015 }
 0x6a7   : > { %v1740_v19 = vmul.f32 %v4016_v17, %v4012_v10  ;;  %v3952_v17 = vld [vmem:[%s4993_s5 + $0x28] sm:$0xff]  }
 0x6a8   : > { %v4018_v18 = vpop.eup %4017 }
 0x6a9   : > { %v1741_v20 = vmul.f32 %v4018_v18, %v4014_v13 }
 0x6ab   : > { %v1742_v22 = vpack.c.bf16 %v1741_v20, %v1740_v19 }
 0x6ad   : > { %3700 = vmatmul.mubr.msk.bf16.vlgmr.msra.gmra.mrb[24].mxu0 %vm1490_vm2, %v1742_v22 }
 0x6ae   : > { %3704 = vmatpush3.bf16.msra.mxu0 %v3941_v21  ;;  %3707 = vmatprep.mubr.msk.bf16.mxu0 %vm4126_vm0, %v4125_v1  ;;  %v3953_v21 = vld [vmem:[%s4990_s2 + $0xc0] sm:$0xff]  }
 0x6af   : > { %3705 = vmatprep.subr.bf16.mxu0 %v4125_v1 }
 0x6b2   : > { %3706 = vmatpush3.bf16.msra.mxu0 %v3942_v23 }
 0x6b3   : > { %3719 = vmatprep.subr.bf16.mxu0 %v4125_v1 }
 0x780   : > { %v1782_v24 = vpop.f32.mrb[24].mxu0 }
 0x781   : > { %v3701_v25 = vpop.f32.mrb[25].mxu0 }
 0x782   : > { %v1785_v26 = vpop.f32.mrb[26].mxu0  ;;  %v3955_v25 = vld [vmem:[%s4990_s2 + $0xd0] sm:$0xff]  }
 0x783   : > { %v1789_v28 = vpack.c.bf16 %v1785_v26, %v1782_v24  ;;  %v3702_v29 = vpop.f32.mrb[27].mxu0  ;;  %v3954_v24 = vld [vmem:[%s4990_s2 + $0xc8] sm:$0xff]   ;;  %v3956_v26 = vld [vmem:[%s4990_s2 + $0xd8] sm:$0xff]  }
 0x784   : > { %v3959_v29 = vld [vmem:[%s4990_s2 + $0xf0] sm:$0xff]  }
 0x785   : > { %3708 = vmatmul.mubr.msk.bf16.vlgmr.msra.gmra.mrb[28].mxu0 %vm563_vm1, %v1789_v28  ;;  %v3958_v28 = vld [vmem:[%s4990_s2 + $0xe8] sm:$0xff]  }
 0x786   : > { %3720 = vmatpush3.bf16.msra.mxu0 %v3943_v27  ;;  %3735 = vmatprep.mubr.msk.bf16.mxu0 %vm4126_vm0, %v4125_v1  ;;  %v3957_v27 = vld [vmem:[%s4990_s2 + $0xe0] sm:$0xff]  }
 0x787   : > { %3721 = vmatprep.subr.bf16.mxu0 %v4125_v1 }
 0x78a   : > { %3722 = vmatpush3.bf16.msra.mxu0 %v3944_v30  ;;  %v3960_v30 = vld [vmem:[%s4990_s2 + $0xf8] sm:$0xff]  }
 0x78b   : > { %3723 = vmatprep.subr.bf16.mxu0 %v4125_v1 }
 0x78e   : > { %3724 = vmatpush3.bf16.msra.mxu0 %v3945_v31 }
 0x78f   : > { %3725 = vmatprep.subr.bf16.mxu0 %v4125_v1 }
 0x792   : > { %3726 = vmatpush3.bf16.msra.mxu0 %v3946_v32 }
 0x793   : > { %3727 = vmatprep.subr.bf16.mxu0 %v4125_v1 }
 0x796   : > { %3728 = vmatpush3.bf16.msra.mxu0 %v3947_v33 }
 0x797   : > { %3729 = vmatprep.subr.bf16.mxu0 %v4125_v1 }
 0x79a   : > { %3730 = vmatpush3.bf16.msra.mxu0 %v3948_v34 }
 0x79b   : > { %3731 = vmatprep.subr.bf16.mxu0 %v4125_v1 }
 0x79e   : > { %3732 = vmatpush3.bf16.msra.mxu0 %v3949_v35 }
 0x79f   : > { %3733 = vmatprep.subr.bf16.mxu0 %v4125_v1 }
 0x7a2   : > { %3734 = vmatpush3.bf16.msra.mxu0 %v3950_v36 }
 0x7a3   : > { %3779 = vmatprep.subr.bf16.mxu0 %v4125_v1 }
 0x7a5   : > { %3736 = vmatmul.mubr.bf16.vlgmr.msra.gmra.mrb[32].mxu0 %v4297_v11 }
 0x7a6   : > { %3781 = vmatprep.mubr.msk.bf16.mxu0 %vm4126_vm0, %v4125_v1 }
 0x7ab   : > { %3780 = vmatpush3.bf16.xpose.msra.mxu0 %v2309_v38 }
 0x7ac   : > { %3785 = vmatprep.subr.bf16.mxu0 %v4125_v1 }
 0x858   : > { %v1844_v39 = vpop.f32.mrb[28].mxu0 }
 0x859   : > { %v4729_v40 = vadd.f32 %v4667_v53, %v1844_v39  ;;  %v3709_v41 = vpop.f32.mrb[29].mxu0 }
 0x85a   : > { %v1847_v42 = vpop.f32.mrb[30].mxu0 }
 0x85b   : > { %v4732_v43 = vadd.f32 %v4669_v55, %v1847_v42  ;;  %v3710_v44 = vpop.f32.mrb[31].mxu0 }
 0x85c   : > { %v2376_v44 = vld [vmem:[#allocation3 + $0x18] sm:$0xff] }
 0x878   : > { %v2006_v45 = vpop.f32.mrb[32].mxu0 }
 0x879   : > { %v3737_v46 = vpop.f32.mrb[33].mxu0 }
 0x87a   : > { %v2009_v47 = vpop.f32.mrb[34].mxu0 }
 0x87b   : > { %v2013_v48 = vpack.c.bf16 %v2009_v47, %v2006_v45  ;;  %v3738_v49 = vpop.f32.mrb[35].mxu0 }
 0x87d   : > { %3742 = vmatmul.mubr.msk.bf16.vlgmr.msra.gmra.mrb[32].mxu1 %vm563_vm1, %v2013_v48 }
 0x87e   : > { %3746 = vmatpush3.bf16.msra.mxu1 %v2087_v50  ;;  %3747 = vmatprep.mubr.msk.bf16.mxu1 %vm4126_vm0, %v4125_v1 }
 0x87f   : > { %3751 = vmatprep.subr.bf16.mxu1 %v4125_v1 }
 0x950   : > { %v2056_v51 = vpop.f32.mrb[32].mxu1 }
 0x951   : > { %v2057_v52 = vadd.f32 %v4602_v2, %v2056_v51  ;;  %v3743_v53 = vpop.f32.mrb[33].mxu1 }
 0x952   : > { %v2059_v54 = vpop.f32.mrb[34].mxu1 }
 0x953   : > { %v2060_v55 = vadd.f32 %v4604_v3, %v2059_v54  ;;  %v3744_v56 = vpop.f32.mrb[35].mxu1  ;;  %v2063_v57 = vsel %vm1490_vm2, %v2057_v52, -inf }
 0x954   : > { %2064 = vmax.xlane.f32.xlu0 %v2063_v57 }
 0x955   : > { %v2066_v58 = vsel %vm1490_vm2, %v2060_v55, -inf }
 0x956   : > { %2067 = vmax.xlane.f32.xlu1 %v2066_v58 }
 0x9e1   : > { %v2065_v59 = vpop.xlane.xlu0 %2064 }
 0x9e2   : > { %v2069_v60 = vsub.f32 %v2057_v52, %v2065_v59 }
 0x9e3   : > { %v2068_v61 = vpop.xlane.xlu1 %2067 }
 0x9e4   : > { %v2071_v62 = vmul.f32 1.442695, %v2069_v60  ;;  %v2070_v63 = vsub.f32 %v2060_v55, %v2068_v61 }
 0x9e6   : > { %4019 = vpow2.f32 %v2071_v62  ;;  %v2073_v0 = vmul.f32 1.442695, %v2070_v63 }
 0x9e8   : > { %4021 = vpow2.f32 %v2073_v0  ;;  %v3961_v0 = vld [vmem:[%s4993_s5 + $0x30] sm:$0xff]  }
 0x9f0   : > { %v4020_v4 = vpop.eup %4019 }
 0x9f1   : > { %v2075_v5 = vsel %vm1490_vm2, %v4020_v4, 0.0 }
 0x9f2   : > { %v4022_v6 = vpop.eup %4021  ;;  %2076 = vadd.xlane.f32.xlu0 %v2075_v5  ;;  %v3962_v5 = vld [vmem:[%s4993_s5 + $0x38] sm:$0xff]  }
 0x9f3   : > { %v2078_v7 = vsel %vm1490_vm2, %v4022_v6, 0.0 }
 0x9f4   : > { %2079 = vadd.xlane.f32.xlu1 %v2078_v7 }
 0xa7f   : > { %v2077_v8 = vpop.xlane.xlu0 %2076 }
 0xa80   : > { %4023 = vrcp.f32 %v2077_v8 }
 0xa81   : > { %v2080_v9 = vpop.xlane.xlu1 %2079 }
 0xa82   : > { %4025 = vrcp.f32 %v2080_v9 }
 0xa8a   : > { %v4024_v10 = vpop.eup %4023 }
 0xa8b   : > { %v2083_v13 = vmul.f32 %v4024_v10, %v4020_v4 }
 0xa8c   : > { %v4026_v12 = vpop.eup %4025 }
 0xa8d   : > { %v2084_v14 = vmul.f32 %v4026_v12, %v4022_v6 }
 0xa8f   : > { %v2085_v16 = vpack.c.bf16 %v2084_v14, %v2083_v13 }
 0xa91   : > { %3748 = vmatmul.mubr.msk.bf16.vlgmr.msra.gmra.mrb[36].mxu1 %vm1490_vm2, %v2085_v16 }
 0xa92   : > { %3752 = vmatpush3.bf16.msra.mxu1 %v3951_v15  ;;  %3755 = vmatprep.mubr.msk.bf16.mxu1 %vm4126_vm0, %v4125_v1 }
 0xa93   : > { %3753 = vmatprep.subr.bf16.mxu1 %v4125_v1 }
 0xa96   : > { %3754 = vmatpush3.bf16.msra.mxu1 %v3952_v17 }
 0xa97   : > { %3759 = vmatprep.subr.bf16.mxu1 %v4125_v1 }
 0xb64   : > { %v2125_v18 = vpop.f32.mrb[36].mxu1 }
 0xb65   : > { %v3749_v19 = vpop.f32.mrb[37].mxu1 }
 0xb66   : > { %v2128_v20 = vpop.f32.mrb[38].mxu1  ;;  %v4044_v19 = vld [vmem:[%s4288_s17 + $0x8] sm:$0xff] }
 0xb67   : > { %v2132_v22 = vpack.c.bf16 %v2128_v20, %v2125_v18  ;;  %v3750_v23 = vpop.f32.mrb[39].mxu1 }
 0xb68   : > { %v3968_v23 = vld [vmem:[%s4996_s8 + $0x14] ss:$8 sps:$4 sm:$0xff]  }
 0xb69   : > { %3756 = vmatmul.mubr.msk.bf16.vlgmr.msra.gmra.mrb[40].mxu1 %vm563_vm1, %v2132_v22  ;;  %v3965_v22 = vld [vmem:[%s4996_s8 + $0x4] ss:$8 sps:$4 sm:$0xff]  }
 0xb6a   : > { %3760 = vmatpush3.bf16.msra.mxu1 %v3953_v21  ;;  %3775 = vmatprep.mubr.msk.bf16.mxu1 %vm4126_vm0, %v4125_v1  ;;  %v3963_v21 = vld [vmem:[%s4996_s8] ss:$8 sps:$4 sm:$0xff]  }
 0xb6b   : > { %3761 = vmatprep.subr.bf16.mxu1 %v4125_v1 }
 0xb6e   : > { %3762 = vmatpush3.bf16.msra.mxu1 %v3954_v24  ;;  %v3966_v24 = vld [vmem:[%s4996_s8 + $0x10] ss:$8 sps:$4 sm:$0xff]  }
 0xb6f   : > { %3763 = vmatprep.subr.bf16.mxu1 %v4125_v1 }
 0xb72   : > { %3764 = vmatpush3.bf16.msra.mxu1 %v3955_v25 }
 0xb73   : > { %3765 = vmatprep.subr.bf16.mxu1 %v4125_v1 }
 0xb76   : > { %3766 = vmatpush3.bf16.msra.mxu1 %v3956_v26 }
 0xb77   : > { %3767 = vmatprep.subr.bf16.mxu1 %v4125_v1 }
 0xb7a   : > { %3768 = vmatpush3.bf16.msra.mxu1 %v3957_v27 }
 0xb7b   : > { %3769 = vmatprep.subr.bf16.mxu1 %v4125_v1 }
 0xb7e   : > { %3770 = vmatpush3.bf16.msra.mxu1 %v3958_v28 }
 0xb7f   : > { %3771 = vmatprep.subr.bf16.mxu1 %v4125_v1 }
 0xb82   : > { %3772 = vmatpush3.bf16.msra.mxu1 %v3959_v29 }
 0xb83   : > { %3773 = vmatprep.subr.bf16.mxu1 %v4125_v1 }
 0xb86   : > { %3774 = vmatpush3.bf16.msra.mxu1 %v3960_v30 }
 0xb89   : > { %3776 = vmatmul.mubr.bf16.vlgmr.msra.gmra.mrb[44].mxu1 %v4297_v11 }
 0xc3c   : > { %v2187_v31 = vpop.f32.mrb[40].mxu1 }
 0xc3d   : > { %v2194_v32 = vadd.f32 %v2187_v31, %v4729_v40  ;;  %v3757_v33 = vpop.f32.mrb[41].mxu1 }
 0xc3e   : > { %v2190_v34 = vpop.f32.mrb[42].mxu1  ;;  %v3971_v33 = vld [vmem:[%s4996_s8 + $0x24] ss:$8 sps:$4 sm:$0xff]  }
 0xc3f   : > { %v2195_v35 = vadd.f32 %v2190_v34, %v4732_v43  ;;  %v3758_v36 = vpop.f32.mrb[43].mxu1  ;;  %v3969_v34 = vld [vmem:[%s4996_s8 + $0x20] ss:$8 sps:$4 sm:$0xff]  }
 0xc40   : > { %v3972_v36 = vld [vmem:[%s4996_s8 + $0x30] ss:$8 sps:$4 sm:$0xff]  }
 0xc5c   : > { %v2295_v37 = vpop.f32.mrb[44].mxu1 }
 0xc5d   : > { %v3777_v38 = vpop.f32.mrb[45].mxu1 }
 0xc5e   : > { %v2298_v39 = vpop.f32.mrb[46].mxu1  ;;  %v3975_v38 = vld [vmem:[%s4996_s8 + $0x40] ss:$8 sps:$4 sm:$0xff]  }
 0xc5f   : > { %v2302_v41 = vpack.c.bf16 %v2298_v39, %v2295_v37  ;;  %v3778_v42 = vpop.f32.mrb[47].mxu1  ;;  %v3977_v37 = vld [vmem:[%s4996_s8 + $0x44] ss:$8 sps:$4 sm:$0xff]   ;;  %v3980_v39 = vld [vmem:[%s4996_s8 + $0x54] ss:$8 sps:$4 sm:$0xff]  }
 0xc60   : > { %v3983_v42 = vld [vmem:[%s4996_s8 + $0x64] ss:$8 sps:$4 sm:$0xff]  }
 0xc61   : > { %3782 = vmatmul.mubr.msk.bf16.vlgmr.msra.gmra.mrb[36].mxu0 %vm563_vm1, %v2302_v41  ;;  %v3978_v41 = vld [vmem:[%s4996_s8 + $0x50] ss:$8 sps:$4 sm:$0xff]  }
 0xc62   : > { %3786 = vmatpush3.bf16.msra.mxu0 %v2376_v44  ;;  %3787 = vmatprep.mubr.msk.bf16.mxu0 %vm4126_vm0, %v4125_v1  ;;  %v3981_v44 = vld [vmem:[%s4996_s8 + $0x60] ss:$8 sps:$4 sm:$0xff]  }
 0xc63   : > { %3791 = vmatprep.subr.bf16.mxu0 %v4125_v1 }
 0xd34   : > { %v2345_v11 = vpop.f32.mrb[36].mxu0 }
 0xd35   : > { %v2346_v40 = vadd.f32 %v4602_v2, %v2345_v11  ;;  %v3783_v45 = vpop.f32.mrb[37].mxu0  ;;  %v3986_v11 = vld [vmem:[%s4996_s8 + $0x74] ss:$8 sps:$4 sm:$0xff]  }
 0xd36   : > { %v2348_v43 = vpop.f32.mrb[38].mxu0  ;;  %v4127_v45 = vmov 0  }
 0xd37   : > { %v2349_v46 = vadd.f32 %v4604_v3, %v2348_v43  ;;  %v3784_v47 = vpop.f32.mrb[39].mxu0  ;;  %v2352_v48 = vsel %vm1490_vm2, %v2346_v40, -inf  ;;  %v3987_v43 = vld [vmem:[%s4997_s9 + $0x40] sm:$0xff]  }
 0xd38   : > { %2353 = vmax.xlane.f32.xlu0 %v2352_v48  ;;  %v3989_v47 = vld [vmem:[%s4997_s9 + $0x48] sm:$0xff]   ;;  %3457 = vmatprep.subr.bf16.mxu1 %v3987_v43 }
 0xd39   : > { %v2355_v49 = vsel %vm1490_vm2, %v2349_v46, -inf  ;;  %v3990_v48 = vld [vmem:[%s4997_s9 + $0x8] sm:$0xff]  }
 0xd3a   : > { %2356 = vmax.xlane.f32.xlu1 %v2355_v49  ;;  %v3991_v49 = vld [vmem:[%s4997_s9 + $0x50] sm:$0xff]  }
 0xdc5   : > { %v2354_v50 = vpop.xlane.xlu0 %2353 }
 0xdc6   : > { %v2358_v51 = vsub.f32 %v2346_v40, %v2354_v50  ;;  %v3984_v40 = vld [vmem:[%s4996_s8 + $0x70] ss:$8 sps:$4 sm:$0xff]  }
 0xdc7   : > { %v2357_v52 = vpop.xlane.xlu1 %2356  ;;  %v3992_v50 = vld [vmem:[%s4997_s9 + $0x10] sm:$0xff]  }
 0xdc8   : > { %v2360_v53 = vmul.f32 1.442695, %v2358_v51  ;;  %v2359_v54 = vsub.f32 %v2349_v46, %v2357_v52  ;;  %v3988_v46 = vld [vmem:[%s4997_s9] sm:$0xff]   ;;  %v3993_v51 = vld [vmem:[%s4997_s9 + $0x58] sm:$0xff]  }
 0xdc9   : > { %3458 = vmatpush3.bf16.msra.mxu1 %v3988_v46  ;;  %v3994_v52 = vld [vmem:[%s4997_s9 + $0x18] sm:$0xff]  }
 0xdca   : > { %4027 = vpow2.f32 %v2360_v53  ;;  %v2362_v55 = vmul.f32 1.442695, %v2359_v54  ;;  %3459 = vmatprep.subr.bf16.mxu1 %v3989_v47  ;;  %v3995_v53 = vld [vmem:[%s4997_s9 + $0x60] sm:$0xff]  }
 0xdcb   : > { %v3996_v54 = vld [vmem:[%s4997_s9 + $0x20] sm:$0xff]  }
 0xdcc   : > { %4029 = vpow2.f32 %v2362_v55  ;;  %v3997_v55 = vld [vmem:[%s4997_s9 + $0x68] sm:$0xff]   ;;  %v3308_v47 = vld [vmem:[%s4998_s10] ss:$0 sm:$0xff] }
 0xdcd   : > { %3460 = vmatpush3.bf16.msra.mxu1 %v3990_v48 }
 0xdce   : > { %3461 = vmatprep.subr.bf16.mxu1 %v3991_v49 }
 0xdd1   : > { %3462 = vmatpush3.bf16.msra.mxu1 %v3992_v50  ;;  %v3309_v50 = vld [vmem:[%s4999_s11] ss:$0 sm:$0xff] }
 0xdd2   : > { %3463 = vmatprep.subr.bf16.mxu1 %v3993_v51 }
 0xdd4   : > { %v4028_v2 = vpop.eup %4027 }
 0xdd5   : > { %v2364_v56 = vsel %vm1490_vm2, %v4028_v2, 0.0  ;;  %3464 = vmatpush3.bf16.msra.mxu1 %v3994_v52 }
 0xdd6   : > { %v4030_v57 = vpop.eup %4029  ;;  %2365 = vadd.xlane.f32.xlu0 %v2364_v56  ;;  %3465 = vmatprep.subr.bf16.mxu1 %v3995_v53 }
 0xdd7   : > { %v2367_v3 = vsel %vm1490_vm2, %v4030_v57, 0.0 }
 0xdd8   : > { %2368 = vadd.xlane.f32.xlu1 %v2367_v3 }
 0xdd9   : > { %3466 = vmatpush3.bf16.msra.mxu1 %v3996_v54 }
 0xdda   : > { %3467 = vmatprep.subr.bf16.mxu1 %v3997_v55 }
 0xe63   : > { %v2366_v58 = vpop.xlane.xlu0 %2365 }
 0xe64   : > { %4031 = vrcp.f32 %v2366_v58 }
 0xe65   : > { %v2369_v59 = vpop.xlane.xlu1 %2368 }
 0xe66   : > { %4033 = vrcp.f32 %v2369_v59 }
 0xe6e   : > { %v4032_v60 = vpop.eup %4031 }
 0xe6f   : > { %v2372_v62 = vmul.f32 %v4032_v60, %v4028_v2  ;;  %v3998_v2 = vld [vmem:[%s4997_s9 + $0x28] sm:$0xff]  }
 0xe70   : > { %v4034_v61 = vpop.eup %4033  ;;  %3468 = vmatpush3.bf16.msra.mxu1 %v3998_v2 }
 0xe71   : > { %v2373_v63 = vmul.f32 %v4034_v61, %v4030_v57 }
 0xe73   : > { %v2374_v4 = vpack.c.bf16 %v2373_v63, %v2372_v62  ;;  %v3274_v62 = vld [vmem:[%s4994_s6] ss:$0 sm:$0xff] }
 0xe75   : > { %3788 = vmatmul.mubr.msk.bf16.vlgmr.msra.gmra.mrb[40].mxu0 %vm1490_vm2, %v2374_v4 }
 0xe76   : > { %3792 = vmatpush3.bf16.msra.mxu0 %v3961_v0  ;;  %3795 = vmatprep.mubr.msk.bf16.mxu0 %vm4126_vm0, %v4125_v1 }
 0xe77   : > { %3793 = vmatprep.subr.bf16.mxu0 %v4125_v1  ;;  %v4043_v1 = vld [vmem:[%s4288_s17] sm:$0xff]  ;;  %s434_s17 = sand.u32 1, %s4107_s22  }
 0xe78   : > { %s2999_s28 = sshll.u32 %s434_s17, 4  ;;  %s4942_s30 = scalar_lea.sflag [#allocation5], %s434_s17 }
 0xe79   : > { %s436_s25 = scalar_lea.vmem [#allocation4], %s2999_s28  ;;  %s4128_s28 = smov [#allocation4]  }
 0xe7a   : > { %3794 = vmatpush3.bf16.msra.mxu0 %v3962_v5  ;;  %s2903_s29 = sshll.u32 %s436_s25, 4  ;;  %s4049_s14 = sshll.u32 %s4128_s28, 4  ;;  %s4940_s29 = int_to_ptr.vmem [resolvable:$true] %s2903_s29  ;;  %s4050_s14 = int_to_ptr.vmem [resolvable:$false] %s4049_s14 }
 0xe7b   : > { %2625 = vmatprep.subr.bf16.mxu0 %v3965_v22  ;;  %s4045_s24 = scalar_lea.vmem %s4940_s29, 256  ;;  %s4051_s0 = scalar_lea.vmem %s4050_s14, 512 }
 0xe7c   : > { %p4046_p12 = scmp.ne.s32.totalorder %s4940_s29, %s4045_s24  ;;  %p4052_p1 = scmp.lt.s32.totalorder %s4940_s29, %s4050_s14 }
 0xe7d   : > { %p4053_p2 = scmp.lt.s32.totalorder %s4051_s0, %s4045_s24 }
 0xe7e   : > { %p4047_p13 = pnand %p4046_p12, %p4236_p4 }
 0xe7f   : > { %p4054_p3 = por %p4053_p2, %p4052_p1 }
 0xe80   : > { %p4048_p0 = pneg %p4047_p13 }
 0xe82   : > { %p4055_p5 = pnand %p4054_p3, %p4048_p0 }
 0xf48   : > { %v2414_v6 = vpop.f32.mrb[40].mxu0 }
 0xf49   : > { %v3789_v7 = vpop.f32.mrb[41].mxu0 }
 0xf4a   : > { %v2417_v8 = vpop.f32.mrb[42].mxu0 }
 0xf4b   : > { %v2421_v9 = vpack.c.bf16 %v2417_v8, %v2414_v6  ;;  %v3790_v10 = vpop.f32.mrb[43].mxu0  ;;  %v3275_v6 = vld [vmem:[%s4995_s7] ss:$0 sm:$0xff] }
 0xf4d   : > { %3796 = vmatmul.mubr.msk.bf16.vlgmr.msra.gmra.mrb[44].mxu0 %vm563_vm1, %v2421_v9 }
 0xf4e   : > { %2626 = vmatpush1.bf16.msra.mxu0 %v3963_v21  ;;  %2657 = vmatprep.mubr.bf16.mxu0 %v4127_v45 }
 0xf4f   : > { %2627 = vmatprep.subr.bf16.mxu0 %v3968_v23 }
 0xf52   : > { %2628 = vmatpush1.bf16.msra.mxu0 %v3966_v24 }
 0xf53   : > { %2629 = vmatprep.subr.bf16.mxu0 %v3971_v33 }
 0xf56   : > { %2630 = vmatpush1.bf16.msra.mxu0 %v3969_v34 }
0x1020   : > { %v2476_v12 = vpop.f32.mrb[44].mxu0 }
0x1021   : > { %v2483_v13 = vadd.f32 %v2476_v12, %v2194_v32  ;;  %v3797_v14 = vpop.f32.mrb[45].mxu0  ;;  %v3999_v12 = vld [vmem:[%s4997_s9 + $0x70] sm:$0xff]  }
0x1022   : > { %v2479_v15 = vpop.f32.mrb[46].mxu0  ;;  %3469 = vmatprep.subr.bf16.mxu1 %v3999_v12  ;;  %v4001_v14 = vld [vmem:[%s4997_s9 + $0x78] sm:$0xff]  }
0x1023   : > { %v2484_v16 = vadd.f32 %v2479_v15, %v2195_v35  ;;  %v3798_v17 = vpop.f32.mrb[47].mxu0  ;;  %v2485_v18 = vadd.f32 %v4043_v1, %v2483_v13  ;;  %v3974_v35 = vld [vmem:[%s4996_s8 + $0x34] ss:$8 sps:$4 sm:$0xff]  }
0x1024   : > { %2631 = vmatprep.subr.bf16.mxu0 %v3974_v35  ;;  %v4000_v13 = vld [vmem:[%s4997_s9 + $0x30] sm:$0xff]   ;;  %v4002_v15 = vld [vmem:[%s4997_s9 + $0x38] sm:$0xff]  }
0x1025   : > { %2487 = vadd.xlane.f32.xlu0 %v2485_v18  ;;  %v2486_v20 = vadd.f32 %v4044_v19, %v2484_v16  ;;  %2632 = vmatpush1.bf16.msra.mxu0 %v3972_v36 }
0x1026   : > { %2633 = vmatprep.subr.bf16.mxu0 %v3977_v37  ;;  %3470 = vmatpush3.bf16.msra.mxu1 %v4000_v13 }
0x1027   : > { %2489 = vadd.xlane.f32.xlu1 %v2486_v20  ;;  %3471 = vmatprep.subr.bf16.mxu1 %v4001_v14 }
0x1029   : > { %2634 = vmatpush1.bf16.msra.mxu0 %v3975_v38 }
0x102a   : > { %2635 = vmatprep.subr.bf16.mxu0 %v3980_v39  ;;  %3472 = vmatpush3.bf16.msra.mxu1 %v4002_v15 }
0x102d   : > { %2636 = vmatpush1.bf16.msra.mxu0 %v3978_v41 }
0x102e   : > { %2637 = vmatprep.subr.bf16.mxu0 %v3983_v42 }
0x1031   : > { %2638 = vmatpush1.bf16.msra.mxu0 %v3981_v44 }
0x1032   : > { %2639 = vmatprep.subr.bf16.mxu0 %v3986_v11 }
0x1035   : > { %2640 = vmatpush1.bf16.msra.mxu0 %v3984_v40 }
0x10b2   : > { %v2488_v25 = vpop.xlane.xlu0 %2487 }
0x10b3   : > { %v2492_v26 = vmul.f32 0.0078125, %v2488_v25 }
0x10b4   : > { %v2490_v27 = vpop.xlane.xlu1 %2489 }
0x10b5   : > { %v4827_v28 = vsub.f32 %v2485_v18, %v2492_v26  ;;  %v2493_v29 = vmul.f32 0.0078125, %v2490_v27 }
0x10b7   : > { %v4829_v30 = vsub.f32 %v2486_v20, %v2493_v29  ;;  %v2496_v31 = vmul.f32 %v4827_v28, %v4827_v28 }
0x10b9   : > { %2498 = vadd.xlane.f32.xlu0 %v2496_v31  ;;  %v2497_v32 = vmul.f32 %v4829_v30, %v4829_v30 }
0x10bb   : > { %2500 = vadd.xlane.f32.xlu1 %v2497_v32 }
0x1146   : > { %v2499_v56 = vpop.xlane.xlu0 %2498 }
0x1147   : > { %v2502_v57 = vmul.f32 0.0078125, %v2499_v56 }
0x1148   : > { %v2501_v3 = vpop.xlane.xlu1 %2500 }
0x1149   : > { %v2504_v58 = vadd.f32 1e-05, %v2502_v57  ;;  %v2503_v59 = vmul.f32 0.0078125, %v2501_v3 }
0x114b   : > { %4035 = vrsqrt.f32 %v2504_v58  ;;  %v2505_v60 = vadd.f32 1e-05, %v2503_v59 }
0x114d   : > { %4037 = vrsqrt.f32 %v2505_v60 }
0x1155   : > { %v4036_v61 = vpop.eup %4035 }
0x1156   : > { %v2508_v63 = vmul.f32 %v4036_v61, %v4827_v28 }
0x1157   : > { %v4038_v0 = vpop.eup %4037 }
0x1158   : > { %v2509_v4 = vmul.f32 %v4038_v0, %v4829_v30  ;;  %v2517_v5 = vmul.f32 %v3274_v62, %v2508_v63 }
0x115a   : > { %v2518_v7 = vmul.f32 %v3274_v62, %v2509_v4  ;;  %v2526_v8 = vadd.f32 %v3275_v6, %v2517_v5 }
0x115c   : > { %v2527_v9 = vadd.f32 %v3275_v6, %v2518_v7 }
0x115e   : > { %v2528_v10 = vpack.c.bf16 %v2527_v9, %v2526_v8 }
0x1160   : > { %2658 = vmatmul.mubr.bf16.vlgmr.msra.gmra.mrb[48].mxu0 %v2528_v10 }
0x1233   : > { %v2659_v16 = vpop.f32.mrb[48].mxu0 }
0x1234   : > { %v2661_v17 = vpop.f32.mrb[49].mxu0  ;;  %v2668_v18 = vmax.f32 %v2659_v16, 0.0 }
0x1235   : > { %v2663_v1 = vpop.f32.mrb[50].mxu0  ;;  %v2669_v21 = vmax.f32 %v2661_v17, 0.0 }
0x1236   : > { %v2670_v19 = vmax.f32 %v2663_v1, 0.0  ;;  %v2665_v20 = vpop.f32.mrb[51].mxu0 }
0x1237   : > { %v2671_v22 = vmax.f32 %v2665_v20, 0.0 }
0x1238   : > { %v2672_v23 = vpack.c.bf16 %v2670_v19, %v2668_v18 }
0x1239   : > { %v2673_v24 = vpack.c.bf16 %v2671_v22, %v2669_v21 }
0x123b   : > { %2834 = vmatprep.mubr.bf16.mxu1 %v2673_v24 }
0x123c   : > { %2835 = vmatmul.mubr.bf16.vlgmr.msra.gmra.mrb[48].mxu1 %v2672_v23 }
0x130f   : > { %v3473_v25 = vpop.f32.mrb[48].mxu1 }
0x1310   : > { %v3474_v26 = vpop.f32.mrb[49].mxu1 }
0x1311   : > { %v3475_v27 = vadd.f32 %v3474_v26, %v3473_v25  ;;  %v3476_v28 = vpop.f32.mrb[50].mxu1 }
0x1312   : > { %v3477_v29 = vpop.f32.mrb[51].mxu1 }
0x1313   : > { %v3478_v30 = vadd.f32 %v3477_v29, %v3476_v28  ;;  %v2843_v31 = vadd.f32 %v3475_v27, %v2526_v8 }
0x1315   : > { %2845 = vadd.xlane.f32.xlu0 %v2843_v31  ;;  %v2844_v32 = vadd.f32 %v3478_v30, %v2527_v9 }
0x1317   : > { %2847 = vadd.xlane.f32.xlu1 %v2844_v32 }
0x13a2   : > { %v2846_v33 = vpop.xlane.xlu0 %2845 }
0x13a3   : > { %v2849_v34 = vmul.f32 0.0078125, %v2846_v33 }
0x13a4   : > { %v2848_v35 = vpop.xlane.xlu1 %2847 }
0x13a5   : > { %v2851_v36 = vsub.f32 %v2843_v31, %v2849_v34  ;;  %v2850_v37 = vmul.f32 0.0078125, %v2848_v35 }
0x13a7   : > { %v2852_v38 = vsub.f32 %v2844_v32, %v2850_v37  ;;  %v2853_v39 = vmul.f32 %v2851_v36, %v2851_v36 }
0x13a9   : > { %2855 = vadd.xlane.f32.xlu0 %v2853_v39  ;;  %v2854_v41 = vmul.f32 %v2852_v38, %v2852_v38 }
0x13ab   : > { %2857 = vadd.xlane.f32.xlu1 %v2854_v41 }
0x1436   : > { %v2856_v42 = vpop.xlane.xlu0 %2855 }
0x1437   : > { %v2859_v44 = vmul.f32 0.0078125, %v2856_v42 }
0x1438   : > { %v2858_v11 = vpop.xlane.xlu1 %2857 }
0x1439   : > { %v2861_v40 = vadd.f32 1e-05, %v2859_v44  ;;  %v2860_v45 = vmul.f32 0.0078125, %v2858_v11 }
0x143b   : > { %4039 = vrsqrt.f32 %v2861_v40  ;;  %v2862_v43 = vadd.f32 1e-05, %v2860_v45 }
0x143d   : > { %4041 = vrsqrt.f32 %v2862_v43 }
0x1445   : > { %v4040_v46 = vpop.eup %4039 }
0x1446   : > { %v2865_v48 = vmul.f32 %v4040_v46, %v2851_v36 }
0x1447   : > { %v4042_v49 = vpop.eup %4041 }
0x1448   : > { %v2874_v51 = vmul.f32 %v3308_v47, %v2865_v48  ;;  %v2866_v52 = vmul.f32 %v4042_v49, %v2852_v38 }
0x144a   : > { %v2875_v53 = vmul.f32 %v3308_v47, %v2866_v52  ;;  %v2883_v54 = vadd.f32 %v3309_v50, %v2874_v51 }
0x144c   : > { %v2884_v55 = vadd.f32 %v3309_v50, %v2875_v53  ;;  %2885 = vst [vmem:[%s436_s25] sm:$0xff] %v2883_v54 }
0x144e   : > { %2886 = vst [vmem:[%s436_s25 + $0x8] sm:$0xff] %v2884_v55 }
0x144f   : > { %4058 = shalt.err (!%p4055_p5)
}
0x1450   : > { %s4059_s17 = scalar_lea.hbm %s4938_s1, 256  ;;  %s4063_s19 = scalar_lea.hbm %s5000_s12, 512 }
0x1451   : > { %p4060_p6 = scmp.ne.s32.totalorder %s4938_s1, %s4059_s17  ;;  %p4064_p10 = scmp.lt.u32.totalorder %s4938_s1, %s5000_s12 }
0x1452   : > { %p4065_p11 = scmp.lt.u32.totalorder %s4063_s19, %s4059_s17  ;;  %p4067_p13 = scmp.lt.u32.totalorder %s4059_s17, %s4938_s1 }
0x1453   : > { %p4061_p7 = pnand %p4060_p6, %p4236_p4 }
0x1454   : > { %p4066_p12 = por %p4065_p11, %p4064_p10 }
0x1455   : > { %p4062_p9 = pneg %p4061_p7 }
0x1456   : > { %p4068_p0 = por %p4067_p13, %p4066_p12 }
0x1458   : > { %p4069_p1 = pnand %p4068_p0, %p4062_p9 }
0x145a   : > { %4072 = shalt.err (!%p4069_p1)
}
0x145b   : > { %s4129_s24 = smov 128   ;;  %s4130_s28 = smov 8  }
0x145c   : > { %3799 = dma.vmem_to_hbm [thread:$0]  (%p4236_p4), %s4940_s29, 256, %s4938_s1, %s4942_s30, %s4129_s24, %s4129_s24, %s4130_s28  }
0x145d PF: > { %p3805_p2 = scmp.ge.s32.totalorder %s4123_s26, 2  ;;  %s2918_s14 = sand.u32 1, %s4103_s21  }
0x145e   : > { %s2919_s0 = scalar_lea.sflag [#allocation5], %s2918_s14 }
0x145f   : > { %p3802_p3 = pnand %p3805_p2, %p4243_p8 }
0x1461   : > { %4098 = dma.done.wait (!%p3802_p3), %s2919_s0, 256  }
0x1462   : > { %4100 = vsyncadd (!%p3802_p3), %s2919_s0, 4294967040  ;;  %s25_s26 = sadd.s32 1, %s4123_s26   ;;  %s5011_s24 = sld [smem:[#allocation7_spill]] }
0x1463   : > { %p22_p5 = scmp.ge.s32.totalorder %s25_s26, 4   ;;  %s5012_s25 = sld [smem:[#allocation8_spill]] }
0x1464   : > { %s5013_s21 = smov %s4107_s22  ;;  %s5014_s22 = smov %s4111_s23 }
0x1465   : > { %s5015_s23 = smov %s4249_s16  ;;  %24 = sbr.rel (!%p22_p5) target bundleno = 7 (0x7), region = 135 }
0x146c   :  { %2924 = vsyncpa [#allocation5], 1 }
0x146d   :  { %2926 = vsyncpa [#allocation5 + $0x1], 1 }

</bundles_post_ra>
